<compile_context>
chip_gen: v7x
topology: tpu7x:2x2x1
jax: 0.10.0
libtpu: 0.0.40
codegen_flags: <defaults>
</compile_context>

<pallas_src>
import math
from functools import partial

import jax
import jax.numpy as jnp
from jax.experimental import pallas as pl
from jax.experimental.pallas import tpu as pltpu


def _round_up(x, m):
    return ((x + m - 1) // m) * m


def _pad_to(a, n_rows, n_cols):
    """Zero-pad the last two dims of `a` up to (n_rows, n_cols)."""
    pr = n_rows - a.shape[-2]
    pc = n_cols - a.shape[-1]
    if pr == 0 and pc == 0:
        return a
    pad = [(0, 0)] * (a.ndim - 2) + [(0, pr), (0, pc)]
    return jnp.pad(a, pad)


def _vmem_capacity_bytes():
    try:
        cap = getattr(pltpu.get_tpu_info(), "vmem_capacity_bytes", None)
        if cap:
            return int(cap)
    except Exception:
        pass
    return 64 * 2 ** 20  # conservative (v7x-sized) fallback, safe on all chips


def _cross_view_attention_kernel(
    x_f_ref, x_s_ref,                 # (TB, Np, Dp) compute dtype
    wq_ref, wk_ref, wv_ref,           # (Dp, Dp)
    wct_ref, wcb_ref,                 # (Dp, Dp)  co-occur weight split (top/bot)
    b_ref,                            # (4, Dp)   rows: q, k, v, cooccur biases (f32)
    out_f_ref, out_s_ref,             # (TB, Np, Dp) f32
    *, n_valid, inv_sqrt_d,
):
    TB, Np, Dp = x_f_ref.shape
    cdt = x_f_ref.dtype
    R = TB * Np

    bq = b_ref[0:1, :]
    bk = b_ref[1:2, :]
    bv = b_ref[2:3, :]
    bc = b_ref[3:4, :]

    # Stack the two views inside VMEM (sublane-aligned: Np is a multiple of the
    # sublane pack) so each projection is ONE (2R, Dp)@(Dp, Dp) MXU matmul.
    xf2 = x_f_ref[...].reshape(R, Dp)
    xs2 = x_s_ref[...].reshape(R, Dp)
    x_all = jnp.concatenate([xf2, xs2], axis=0)                       # (2R, Dp)

    q = (jnp.dot(x_all, wq_ref[...], preferred_element_type=jnp.float32) + bq).astype(cdt)
    k = (jnp.dot(x_all, wk_ref[...], preferred_element_type=jnp.float32) + bk).astype(cdt)
    v = (jnp.dot(x_all, wv_ref[...], preferred_element_type=jnp.float32) + bv).astype(cdt)

    # co_occur = ReLU([x_f, x_s] @ Wc + bc) without materializing the lane concat.
    co = jnp.dot(xf2, wct_ref[...], preferred_element_type=jnp.float32)
    co = co + jnp.dot(xs2, wcb_ref[...], preferred_element_type=jnp.float32)
    co = jnp.maximum(co + bc, 0.0).reshape(TB, Np, Dp)                # f32

    q_f = q[:R].reshape(TB, Np, Dp)
    q_s = q[R:].reshape(TB, Np, Dp)
    k_f = k[:R].reshape(TB, Np, Dp)
    k_s = k[R:].reshape(TB, Np, Dp)
    v_f = v[:R].reshape(TB, Np, Dp)
    v_s = v[R:].reshape(TB, Np, Dp)

    # Padded token rows must not act as softmax keys.
    if Np > n_valid:
        kcol = jax.lax.broadcasted_iota(jnp.int32, (1, 1, Np), 2)
        key_bias = jnp.where(kcol < n_valid, 0.0, -1e30).astype(jnp.float32)
    else:
        key_bias = None

    approx_recip = bool(cdt.itemsize < 4)  # EUP rcp is plenty for bf16 operands

    def attend(q_, k_, v_):
        # Batched scores contracting the hidden dim directly (no K transpose).
        s = jnp.einsum("bqd,bkd->bqk", q_, k_,
                       preferred_element_type=jnp.float32)            # (TB,Np,Np)
        if key_bias is not None:
            s = s + key_bias
        m = jnp.max(s, axis=-1, keepdims=True)
        p = jnp.exp(s - m)
        denom = jnp.sum(p, axis=-1, keepdims=True)                    # (TB,Np,1)
        o = jnp.einsum("bqk,bkd->bqd", p.astype(cdt), v_,
                       preferred_element_type=jnp.float32)            # (TB,Np,Dp)
        # softmax normalization + 1/sqrt(hidden_dim) folded into one row scale
        # on the (Np, Dp) output; F.normalize(p=1) after softmax is a no-op.
        return o * (inv_sqrt_d * pl.reciprocal(denom, approx=approx_recip))

    # Store out_f before computing the second attention so only one (Np, Np)
    # score / p matrix is live at a time (bounds peak VMEM / vreg pressure).
    out_f_ref[...] = (attend(q_f, k_s, v_f) + co).astype(out_f_ref.dtype)
    out_s_ref[...] = (attend(q_s, k_f, v_s) + co).astype(out_s_ref.dtype)


def cross_view_attention(x_f, x_s, params, *,
                         compute_dtype=jnp.bfloat16, out_dtype=jnp.float32):
    """x_f, x_s: (B, N, D). params: dict of pre-transposed Linear weights.

    compute_dtype: MXU operand dtype (default bf16). Accumulation, softmax
    statistics and the returned outputs stay f32 (out_dtype).
    """
    B, N, D = x_f.shape
    cdt = jnp.dtype(compute_dtype)
    odt = jnp.dtype(out_dtype)
    Dp = _round_up(D, 128)                       # lane-dense loads / MXU / stores
    sub = max(8, 32 // cdt.itemsize)             # sublane pack: 8 f32, 16 bf16
    Np = _round_up(N, sub)

    # Inputs: pad tokens (masked in-kernel) and hidden lanes (exactly zero).
    x_f_p = _pad_to(x_f, Np, Dp).astype(cdt)
    x_s_p = _pad_to(x_s, Np, Dp).astype(cdt)

    wq = _pad_to(params["wq_t"], Dp, Dp).astype(cdt)
    wk = _pad_to(params["wk_t"], Dp, Dp).astype(cdt)
    wv = _pad_to(params["wv_t"], Dp, Dp).astype(cdt)
    wc_t = params["wc_t"]
    wct = _pad_to(wc_t[:D], Dp, Dp).astype(cdt)  # multiplies x_f
    wcb = _pad_to(wc_t[D:], Dp, Dp).astype(cdt)  # multiplies x_s
    biases = _pad_to(
        jnp.stack([params["bq"], params["bk"], params["bv"], params["bc"]], axis=0),
        4, Dp).astype(jnp.float32)               # (4, Dp)

    # ---- batch tile + generation-aware VMEM sizing -------------------------
    cap = _vmem_capacity_bytes()
    rows_per_b = 2 * Np
    per_b_bytes = (
        2 * Np * Dp * cdt.itemsize * 2           # x_f / x_s blocks, double-buffered
        + 2 * Np * Dp * odt.itemsize * 2         # out_f / out_s blocks, double-buffered
        + 6 * Np * Dp * (4 + cdt.itemsize)       # q/k/v per view: f32 acc + cdt copy
        + 2 * Np * Np * 4                        # one live (Np, Np) score + its exp
        + 3 * Np * Dp * 4                        # co + attend output (f32)
    )
    fixed_bytes = 5 * Dp * Dp * cdt.itemsize * 2 + 4 * Dp * 4 * 2  # weights (budgeted
    budget = int(0.6 * cap)                                        # double-buffered)

    max_by_vmem = max(1, (budget - fixed_bytes) // max(per_b_bytes, 1))
    target_tb = max(1, 512 // max(rows_per_b, 1))      # fill MXU rows per step
    ub = int(min(B, max_by_vmem, target_tb))
    if B > 1:
        ub = min(ub, (B + 1) // 2)                     # keep >=2 grid steps (v7x: 2 TCs)
    tb = 1
    for d in range(max(1, ub), 0, -1):                 # largest divisor of B <= ub
        if B % d == 0:
            tb = d
            break

    est = fixed_bytes + tb * per_b_bytes
    vmem_limit = int(min(int(0.85 * cap), max(32 * 2 ** 20, 2 * est)))

    kernel = partial(_cross_view_attention_kernel,
                     n_valid=N, inv_sqrt_d=1.0 / math.sqrt(D))

    def run(single_buffer_weights):
        const_kw = dict(pipeline_mode=pl.Buffered(1)) if single_buffer_weights else {}
        x_spec = pl.BlockSpec((tb, Np, Dp), lambda i: (i, 0, 0))
        o_spec = pl.BlockSpec((tb, Np, Dp), lambda i: (i, 0, 0))
        w_spec = pl.BlockSpec((Dp, Dp), lambda i: (0, 0), **const_kw)
        b_spec = pl.BlockSpec((4, Dp), lambda i: (0, 0), **const_kw)
        return pl.pallas_call(
            kernel,
            out_shape=(jax.ShapeDtypeStruct((B, Np, Dp), odt),
                       jax.ShapeDtypeStruct((B, Np, Dp), odt)),
            grid_spec=pltpu.PrefetchScalarGridSpec(
                num_scalar_prefetch=0,
                grid=(B // tb,),
                in_specs=[x_spec, x_spec, w_spec, w_spec, w_spec, w_spec, w_spec,
                          b_spec],
                out_specs=[o_spec, o_spec],
            ),
            compiler_params=pltpu.CompilerParams(
                dimension_semantics=("parallel",),
                vmem_limit_bytes=vmem_limit,
            ),
        )(x_f_p, x_s_p, wq, wk, wv, wct, wcb, biases)

    if hasattr(pl, "Buffered"):
        try:
            out_f_p, out_s_p = run(True)
        except Exception:
            # Feature detection only: the sole difference between the attempts
            # is the constant-operand buffering hint, so a genuine kernel error
            # reproduces (and re-raises) from the fallback; vmem_limit already
            # budgets for double-buffered weights, so nothing overflows silently.
            out_f_p, out_s_p = run(False)
    else:
        out_f_p, out_s_p = run(False)

    return out_f_p[:, :N, :D], out_s_p[:, :N, :D]


def init_params(key, hidden_dim):
    """Deterministic synthetic parameters mirroring nn.Linear shapes.

    PyTorch Linear weight is (out, in); we store the transpose (in, out).
    """
    D = hidden_dim
    ks = jax.random.split(key, 8)
    scale = 1.0 / math.sqrt(D)
    scale2 = 1.0 / math.sqrt(2 * D)
    return dict(
        wq_t=jax.random.uniform(ks[0], (D, D), jnp.float32, -scale, scale),
        bq=jax.random.uniform(ks[1], (D,), jnp.float32, -scale, scale),
        wk_t=jax.random.uniform(ks[2], (D, D), jnp.float32, -scale, scale),
        bk=jax.random.uniform(ks[3], (D,), jnp.float32, -scale, scale),
        wv_t=jax.random.uniform(ks[4], (D, D), jnp.float32, -scale, scale),
        bv=jax.random.uniform(ks[5], (D,), jnp.float32, -scale, scale),
        wc_t=jax.random.uniform(ks[6], (2 * D, D), jnp.float32, -scale2, scale2),
        bc=jax.random.uniform(ks[7], (D,), jnp.float32, -scale2, scale2),
    )


def reference(x_f, x_s, params):
    """Pure-JAX reference matching the PyTorch forward (dropout = identity)."""
    D = x_f.shape[-1]

    def lin(x, w_t, b):
        return x @ w_t + b

    def attend(xq, xk, xv):
        q = lin(xq, params["wq_t"], params["bq"])
        k = lin(xk, params["wk_t"], params["bk"])
        v = lin(xv, params["wv_t"], params["bv"])
        s = jnp.einsum("bnd,bmd->bnm", q, k)
        attn = jax.nn.softmax(s, axis=-1)
        l1 = jnp.maximum(jnp.sum(jnp.abs(attn), -1, keepdims=True), 1e-12)
        attn = attn / l1 / jnp.sqrt(jnp.float32(D))
        return jnp.einsum("bnm,bmd->bnd", attn, v)

    cat = jnp.concatenate([x_f, x_s], axis=-1)
    co = jax.nn.relu(lin(cat, params["wc_t"], params["bc"]))
    out_f = attend(x_f, x_s, x_f) + co
    out_s = attend(x_s, x_f, x_s) + co
    return out_f, out_s


if __name__ == "__main__":
    B, N, D = 2, 8, 32
    key = jax.random.PRNGKey(0)
    k_xf, k_xs, k_p = jax.random.split(key, 3)
    x_f = jax.random.normal(k_xf, (B, N, D), jnp.float32)
    x_s = jax.random.normal(k_xs, (B, N, D), jnp.float32)
    params = init_params(k_p, D)

    ref_f, ref_s = reference(x_f, x_s, params)

    # Default path: bf16 MXU operands, f32 accumulation / softmax stats / outputs.
    out_f, out_s = cross_view_attention(x_f, x_s, params)
    jax.block_until_ready((out_f, out_s))
    assert out_f.shape == (B, N, D) and out_s.shape == (B, N, D)
    assert out_f.dtype == jnp.float32 and out_s.dtype == jnp.float32
    assert jnp.allclose(out_f, ref_f, atol=1e-1, rtol=1e-1), "bf16 out_f mismatch"
    assert jnp.allclose(out_s, ref_s, atol=1e-1, rtol=1e-1), "bf16 out_s mismatch"

    # f32 operand path: matches the PyTorch semantics tightly.
    f32_f, f32_s = cross_view_attention(x_f, x_s, params, compute_dtype=jnp.float32)
    jax.block_until_ready((f32_f, f32_s))
    assert jnp.allclose(f32_f, ref_f, atol=1e-4, rtol=1e-4), "f32 out_f mismatch"
    assert jnp.allclose(f32_s, ref_s, atol=1e-4, rtol=1e-4), "f32 out_s mismatch"

    print("KERNEL_OK")
</pallas_src>

<mosaic_0001>
module attributes {stable_mosaic.version = 11 : i64} {
  func.func @_cross_view_attention_kernel(%arg0: i32, %arg1: memref<1x16x128xbf16, #tpu.memory_space<vmem>>, %arg2: memref<1x16x128xbf16, #tpu.memory_space<vmem>>, %arg3: memref<128x128xbf16, #tpu.memory_space<vmem>>, %arg4: memref<128x128xbf16, #tpu.memory_space<vmem>>, %arg5: memref<128x128xbf16, #tpu.memory_space<vmem>>, %arg6: memref<128x128xbf16, #tpu.memory_space<vmem>>, %arg7: memref<128x128xbf16, #tpu.memory_space<vmem>>, %arg8: memref<4x128xf32, #tpu.memory_space<vmem>>, %arg9: memref<1x16x128xf32, #tpu.memory_space<vmem>>, %arg10: memref<1x16x128xf32, #tpu.memory_space<vmem>>) attributes {dimension_semantics = [#tpu.dimension_semantics<parallel>], iteration_bounds = array<i64: 2>, scalar_prefetch = 0 : i64, scratch_operands = 0 : i64, tpu.core_type = #tpu.core_type<tc>, window_params = [{transform_indices = @transform_0, window_bounds = array<i64: 1, 16, 128>}, {transform_indices = @transform_1, window_bounds = array<i64: 1, 16, 128>}, {pipeline_mode = #tpu.pipeline_mode<synchronous>, transform_indices = @transform_2, window_bounds = array<i64: 128, 128>}, {pipeline_mode = #tpu.pipeline_mode<synchronous>, transform_indices = @transform_3, window_bounds = array<i64: 128, 128>}, {pipeline_mode = #tpu.pipeline_mode<synchronous>, transform_indices = @transform_4, window_bounds = array<i64: 128, 128>}, {pipeline_mode = #tpu.pipeline_mode<synchronous>, transform_indices = @transform_5, window_bounds = array<i64: 128, 128>}, {pipeline_mode = #tpu.pipeline_mode<synchronous>, transform_indices = @transform_6, window_bounds = array<i64: 128, 128>}, {pipeline_mode = #tpu.pipeline_mode<synchronous>, transform_indices = @transform_7, window_bounds = array<i64: 4, 128>}, {transform_indices = @transform_8, window_bounds = array<i64: 1, 16, 128>}, {transform_indices = @transform_9, window_bounds = array<i64: 1, 16, 128>}]} {
    %c0 = arith.constant 0 : index
    %c0_0 = arith.constant 0 : index
    %0 = vector.load %arg8[%c0, %c0_0] : memref<4x128xf32, #tpu.memory_space<vmem>>, vector<1x128xf32>
    %c1 = arith.constant 1 : index
    %c0_1 = arith.constant 0 : index
    %1 = vector.load %arg8[%c1, %c0_1] : memref<4x128xf32, #tpu.memory_space<vmem>>, vector<1x128xf32>
    %c2 = arith.constant 2 : index
    %c0_2 = arith.constant 0 : index
    %2 = vector.load %arg8[%c2, %c0_2] : memref<4x128xf32, #tpu.memory_space<vmem>>, vector<1x128xf32>
    %c3 = arith.constant 3 : index
    %c0_3 = arith.constant 0 : index
    %3 = vector.load %arg8[%c3, %c0_3] : memref<4x128xf32, #tpu.memory_space<vmem>>, vector<1x128xf32>
    %c0_4 = arith.constant 0 : index
    %c0_5 = arith.constant 0 : index
    %c0_6 = arith.constant 0 : index
    %4 = vector.load %arg1[%c0_4, %c0_5, %c0_6] : memref<1x16x128xbf16, #tpu.memory_space<vmem>>, vector<1x16x128xbf16>
    %5 = vector.shape_cast %4 : vector<1x16x128xbf16> to vector<16x128xbf16>
    %c0_7 = arith.constant 0 : index
    %c0_8 = arith.constant 0 : index
    %c0_9 = arith.constant 0 : index
    %6 = vector.load %arg2[%c0_7, %c0_8, %c0_9] : memref<1x16x128xbf16, #tpu.memory_space<vmem>>, vector<1x16x128xbf16>
    %7 = vector.shape_cast %6 : vector<1x16x128xbf16> to vector<16x128xbf16>
    %8 = tpu.concatenate %5, %7 in 0 : vector<16x128xbf16>, vector<16x128xbf16> -> vector<32x128xbf16>
    %c0_10 = arith.constant 0 : index
    %c0_11 = arith.constant 0 : index
    %9 = vector.load %arg3[%c0_10, %c0_11] : memref<128x128xbf16, #tpu.memory_space<vmem>>, vector<128x128xbf16>
    %cst = arith.constant dense<0.000000e+00> : vector<32x128xf32>
    %10 = tpu.matmul %8, %9, %cst {dimension_numbers = #tpu.dot_dimension_numbers<[1], [0], [0], [1], [0, 0, 1, 1], [], []>} : vector<32x128xbf16>, vector<128x128xbf16>, vector<32x128xf32> -> vector<32x128xf32>
    %11 = vector.broadcast %0 : vector<1x128xf32> to vector<32x128xf32>
    %12 = arith.addf %10, %11 : vector<32x128xf32>
    %13 = arith.truncf %12 : vector<32x128xf32> to vector<32x128xbf16>
    %c0_12 = arith.constant 0 : index
    %c0_13 = arith.constant 0 : index
    %14 = vector.load %arg4[%c0_12, %c0_13] : memref<128x128xbf16, #tpu.memory_space<vmem>>, vector<128x128xbf16>
    %cst_14 = arith.constant dense<0.000000e+00> : vector<32x128xf32>
    %15 = tpu.matmul %8, %14, %cst_14 {dimension_numbers = #tpu.dot_dimension_numbers<[1], [0], [0], [1], [0, 0, 1, 1], [], []>} : vector<32x128xbf16>, vector<128x128xbf16>, vector<32x128xf32> -> vector<32x128xf32>
    %16 = vector.broadcast %1 : vector<1x128xf32> to vector<32x128xf32>
    %17 = arith.addf %15, %16 : vector<32x128xf32>
    %18 = arith.truncf %17 : vector<32x128xf32> to vector<32x128xbf16>
    %c0_15 = arith.constant 0 : index
    %c0_16 = arith.constant 0 : index
    %19 = vector.load %arg5[%c0_15, %c0_16] : memref<128x128xbf16, #tpu.memory_space<vmem>>, vector<128x128xbf16>
    %cst_17 = arith.constant dense<0.000000e+00> : vector<32x128xf32>
    %20 = tpu.matmul %8, %19, %cst_17 {dimension_numbers = #tpu.dot_dimension_numbers<[1], [0], [0], [1], [0, 0, 1, 1], [], []>} : vector<32x128xbf16>, vector<128x128xbf16>, vector<32x128xf32> -> vector<32x128xf32>
    %21 = vector.broadcast %2 : vector<1x128xf32> to vector<32x128xf32>
    %22 = arith.addf %20, %21 : vector<32x128xf32>
    %23 = arith.truncf %22 : vector<32x128xf32> to vector<32x128xbf16>
    %c0_18 = arith.constant 0 : index
    %c0_19 = arith.constant 0 : index
    %24 = vector.load %arg6[%c0_18, %c0_19] : memref<128x128xbf16, #tpu.memory_space<vmem>>, vector<128x128xbf16>
    %cst_20 = arith.constant dense<0.000000e+00> : vector<16x128xf32>
    %25 = tpu.matmul %5, %24, %cst_20 {dimension_numbers = #tpu.dot_dimension_numbers<[1], [0], [0], [1], [0, 0, 1, 1], [], []>} : vector<16x128xbf16>, vector<128x128xbf16>, vector<16x128xf32> -> vector<16x128xf32>
    %c0_21 = arith.constant 0 : index
    %c0_22 = arith.constant 0 : index
    %26 = vector.load %arg7[%c0_21, %c0_22] : memref<128x128xbf16, #tpu.memory_space<vmem>>, vector<128x128xbf16>
    %cst_23 = arith.constant dense<0.000000e+00> : vector<16x128xf32>
    %27 = tpu.matmul %7, %26, %cst_23 {dimension_numbers = #tpu.dot_dimension_numbers<[1], [0], [0], [1], [0, 0, 1, 1], [], []>} : vector<16x128xbf16>, vector<128x128xbf16>, vector<16x128xf32> -> vector<16x128xf32>
    %28 = arith.addf %25, %27 : vector<16x128xf32>
    %29 = vector.broadcast %3 : vector<1x128xf32> to vector<16x128xf32>
    %30 = arith.addf %28, %29 : vector<16x128xf32>
    %cst_24 = arith.constant 0.000000e+00 : f32
    %31 = vector.broadcast %cst_24 : f32 to vector<16x128xf32>
    %32 = arith.maximumf %30, %31 : vector<16x128xf32>
    %33 = vector.shape_cast %32 : vector<16x128xf32> to vector<1x16x128xf32>
    %34 = vector.extract_strided_slice %13 {offsets = [0, 0], sizes = [16, 128], strides = [1, 1]} : vector<32x128xbf16> to vector<16x128xbf16>
    %35 = vector.shape_cast %34 : vector<16x128xbf16> to vector<1x16x128xbf16>
    %36 = vector.extract_strided_slice %13 {offsets = [16, 0], sizes = [16, 128], strides = [1, 1]} : vector<32x128xbf16> to vector<16x128xbf16>
    %37 = vector.shape_cast %36 : vector<16x128xbf16> to vector<1x16x128xbf16>
    %38 = vector.extract_strided_slice %18 {offsets = [0, 0], sizes = [16, 128], strides = [1, 1]} : vector<32x128xbf16> to vector<16x128xbf16>
    %39 = vector.shape_cast %38 : vector<16x128xbf16> to vector<1x16x128xbf16>
    %40 = vector.extract_strided_slice %18 {offsets = [16, 0], sizes = [16, 128], strides = [1, 1]} : vector<32x128xbf16> to vector<16x128xbf16>
    %41 = vector.shape_cast %40 : vector<16x128xbf16> to vector<1x16x128xbf16>
    %42 = vector.extract_strided_slice %23 {offsets = [0, 0], sizes = [16, 128], strides = [1, 1]} : vector<32x128xbf16> to vector<16x128xbf16>
    %43 = vector.shape_cast %42 : vector<16x128xbf16> to vector<1x16x128xbf16>
    %44 = vector.extract_strided_slice %23 {offsets = [16, 0], sizes = [16, 128], strides = [1, 1]} : vector<32x128xbf16> to vector<16x128xbf16>
    %45 = vector.shape_cast %44 : vector<16x128xbf16> to vector<1x16x128xbf16>
    %46 = tpu.iota {dimensions = array<i32: 2>} : vector<1x1x16xi32>
    %c8_i32 = arith.constant 8 : i32
    %47 = vector.broadcast %c8_i32 : i32 to vector<1x1x16xi32>
    %48 = arith.cmpi slt, %46, %47 : vector<1x1x16xi32>
    %cst_25 = arith.constant 0.000000e+00 : f32
    %cst_26 = arith.constant -1.000000e+30 : f32
    %49 = vector.broadcast %cst_25 : f32 to vector<1x1x16xf32>
    %50 = vector.broadcast %cst_26 : f32 to vector<1x1x16xf32>
    %51 = arith.select %48, %49, %50 : vector<1x1x16xi1>, vector<1x1x16xf32>
    "tpu.trace_start"() <{level = 10 : i32, message = "bqd,bkd->bqk"}> : () -> ()
    %cst_27 = arith.constant dense<0.000000e+00> : vector<1x16x16xf32>
    %52 = tpu.matmul %35, %41, %cst_27 {dimension_numbers = #tpu.dot_dimension_numbers<[2], [2], [1], [1], [0, 0, 0, 1, 1, 1], [0], [0]>} : vector<1x16x128xbf16>, vector<1x16x128xbf16>, vector<1x16x16xf32> -> vector<1x16x16xf32>
    "tpu.trace_stop"() : () -> ()
    %53 = vector.broadcast %51 : vector<1x1x16xf32> to vector<1x16x16xf32>
    %54 = arith.addf %52, %53 : vector<1x16x16xf32>
    %cst_28 = arith.constant dense<0xFF800000> : vector<1x16xf32>
    %55 = vector.multi_reduction <maximumf>, %54, %cst_28 [2] : vector<1x16x16xf32> to vector<1x16xf32>
    %56 = vector.shape_cast %55 : vector<1x16xf32> to vector<1x16x1xf32>
    %57 = vector.broadcast %56 : vector<1x16x1xf32> to vector<1x16x16xf32>
    %58 = arith.subf %54, %57 : vector<1x16x16xf32>
    %59 = math.exp %58 : vector<1x16x16xf32>
    %cst_29 = arith.constant dense<0.000000e+00> : vector<1x16xf32>
    %60 = vector.multi_reduction <add>, %59, %cst_29 [2] : vector<1x16x16xf32> to vector<1x16xf32>
    %61 = vector.shape_cast %60 : vector<1x16xf32> to vector<1x16x1xf32>
    %62 = arith.truncf %59 : vector<1x16x16xf32> to vector<1x16x16xbf16>
    "tpu.trace_start"() <{level = 10 : i32, message = "bqk,bkd->bqd"}> : () -> ()
    %cst_30 = arith.constant dense<0.000000e+00> : vector<1x16x128xf32>
    %63 = tpu.matmul %62, %43, %cst_30 {dimension_numbers = #tpu.dot_dimension_numbers<[2], [1], [1], [2], [0, 0, 0, 1, 1, 2], [0], [0]>} : vector<1x16x16xbf16>, vector<1x16x128xbf16>, vector<1x16x128xf32> -> vector<1x16x128xf32>
    "tpu.trace_stop"() : () -> ()
    %64 = tpu.reciprocal %61 {approx = true} : vector<1x16x1xf32> -> vector<1x16x1xf32>
    %cst_31 = arith.constant 0.176776692 : f32
    %65 = vector.broadcast %cst_31 : f32 to vector<1x16x1xf32>
    %66 = arith.mulf %65, %64 : vector<1x16x1xf32>
    %67 = vector.broadcast %66 : vector<1x16x1xf32> to vector<1x16x128xf32>
    %68 = arith.mulf %63, %67 : vector<1x16x128xf32>
    %69 = arith.addf %68, %33 : vector<1x16x128xf32>
    %c0_32 = arith.constant 0 : index
    %c0_33 = arith.constant 0 : index
    %c0_34 = arith.constant 0 : index
    %70 = vector.load %arg9[%c0_32, %c0_33, %c0_34] : memref<1x16x128xf32, #tpu.memory_space<vmem>>, vector<1x16x128xf32>
    tpu.vector_store %arg9[%c0_32, %c0_33, %c0_34], %69 {strides = array<i32>} : memref<1x16x128xf32, #tpu.memory_space<vmem>>, vector<1x16x128xf32>,
    "tpu.trace_start"() <{level = 10 : i32, message = "bqd,bkd->bqk"}> : () -> ()
    %cst_35 = arith.constant dense<0.000000e+00> : vector<1x16x16xf32>
    %71 = tpu.matmul %37, %39, %cst_35 {dimension_numbers = #tpu.dot_dimension_numbers<[2], [2], [1], [1], [0, 0, 0, 1, 1, 1], [0], [0]>} : vector<1x16x128xbf16>, vector<1x16x128xbf16>, vector<1x16x16xf32> -> vector<1x16x16xf32>
    "tpu.trace_stop"() : () -> ()
    %72 = vector.broadcast %51 : vector<1x1x16xf32> to vector<1x16x16xf32>
    %73 = arith.addf %71, %72 : vector<1x16x16xf32>
    %cst_36 = arith.constant dense<0xFF800000> : vector<1x16xf32>
    %74 = vector.multi_reduction <maximumf>, %73, %cst_36 [2] : vector<1x16x16xf32> to vector<1x16xf32>
    %75 = vector.shape_cast %74 : vector<1x16xf32> to vector<1x16x1xf32>
    %76 = vector.broadcast %75 : vector<1x16x1xf32> to vector<1x16x16xf32>
    %77 = arith.subf %73, %76 : vector<1x16x16xf32>
    %78 = math.exp %77 : vector<1x16x16xf32>
    %cst_37 = arith.constant dense<0.000000e+00> : vector<1x16xf32>
    %79 = vector.multi_reduction <add>, %78, %cst_37 [2] : vector<1x16x16xf32> to vector<1x16xf32>
    %80 = vector.shape_cast %79 : vector<1x16xf32> to vector<1x16x1xf32>
    %81 = arith.truncf %78 : vector<1x16x16xf32> to vector<1x16x16xbf16>
    "tpu.trace_start"() <{level = 10 : i32, message = "bqk,bkd->bqd"}> : () -> ()
    %cst_38 = arith.constant dense<0.000000e+00> : vector<1x16x128xf32>
    %82 = tpu.matmul %81, %45, %cst_38 {dimension_numbers = #tpu.dot_dimension_numbers<[2], [1], [1], [2], [0, 0, 0, 1, 1, 2], [0], [0]>} : vector<1x16x16xbf16>, vector<1x16x128xbf16>, vector<1x16x128xf32> -> vector<1x16x128xf32>
    "tpu.trace_stop"() : () -> ()
    %83 = tpu.reciprocal %80 {approx = true} : vector<1x16x1xf32> -> vector<1x16x1xf32>
    %cst_39 = arith.constant 0.176776692 : f32
    %84 = vector.broadcast %cst_39 : f32 to vector<1x16x1xf32>
    %85 = arith.mulf %84, %83 : vector<1x16x1xf32>
    %86 = vector.broadcast %85 : vector<1x16x1xf32> to vector<1x16x128xf32>
    %87 = arith.mulf %82, %86 : vector<1x16x128xf32>
    %88 = arith.addf %87, %33 : vector<1x16x128xf32>
    %c0_40 = arith.constant 0 : index
    %c0_41 = arith.constant 0 : index
    %c0_42 = arith.constant 0 : index
    %89 = vector.load %arg10[%c0_40, %c0_41, %c0_42] : memref<1x16x128xf32, #tpu.memory_space<vmem>>, vector<1x16x128xf32>
    tpu.vector_store %arg10[%c0_40, %c0_41, %c0_42], %88 {strides = array<i32>} : memref<1x16x128xf32, #tpu.memory_space<vmem>>, vector<1x16x128xf32>,
    return
  }
  func.func @transform_0(%arg0: i32) -> (i32, i32, i32) {
    %c0_i32 = arith.constant 0 : i32
    %c0_i32_0 = arith.constant 0 : i32
    %c0_i32_1 = arith.constant 0 : i32
    return %arg0, %c0_i32, %c0_i32_0 : i32, i32, i32
  }
  func.func @transform_1(%arg0: i32) -> (i32, i32, i32) {
    %c0_i32 = arith.constant 0 : i32
    %c0_i32_0 = arith.constant 0 : i32
    %c0_i32_1 = arith.constant 0 : i32
    return %arg0, %c0_i32, %c0_i32_0 : i32, i32, i32
  }
  func.func @transform_2(%arg0: i32) -> (i32, i32) {
    %c0_i32 = arith.constant 0 : i32
    %c0_i32_0 = arith.constant 0 : i32
    %c0_i32_1 = arith.constant 0 : i32
    return %c0_i32, %c0_i32_0 : i32, i32
  }
  func.func @transform_3(%arg0: i32) -> (i32, i32) {
    %c0_i32 = arith.constant 0 : i32
    %c0_i32_0 = arith.constant 0 : i32
    %c0_i32_1 = arith.constant 0 : i32
    return %c0_i32, %c0_i32_0 : i32, i32
  }
  func.func @transform_4(%arg0: i32) -> (i32, i32) {
    %c0_i32 = arith.constant 0 : i32
    %c0_i32_0 = arith.constant 0 : i32
    %c0_i32_1 = arith.constant 0 : i32
    return %c0_i32, %c0_i32_0 : i32, i32
  }
  func.func @transform_5(%arg0: i32) -> (i32, i32) {
    %c0_i32 = arith.constant 0 : i32
    %c0_i32_0 = arith.constant 0 : i32
    %c0_i32_1 = arith.constant 0 : i32
    return %c0_i32, %c0_i32_0 : i32, i32
  }
  func.func @transform_6(%arg0: i32) -> (i32, i32) {
    %c0_i32 = arith.constant 0 : i32
    %c0_i32_0 = arith.constant 0 : i32
    %c0_i32_1 = arith.constant 0 : i32
    return %c0_i32, %c0_i32_0 : i32, i32
  }
  func.func @transform_7(%arg0: i32) -> (i32, i32) {
    %c0_i32 = arith.constant 0 : i32
    %c0_i32_0 = arith.constant 0 : i32
    %c0_i32_1 = arith.constant 0 : i32
    return %c0_i32, %c0_i32_0 : i32, i32
  }
  func.func @transform_8(%arg0: i32) -> (i32, i32, i32) {
    %c0_i32 = arith.constant 0 : i32
    %c0_i32_0 = arith.constant 0 : i32
    %c0_i32_1 = arith.constant 0 : i32
    return %arg0, %c0_i32, %c0_i32_0 : i32, i32, i32
  }
  func.func @transform_9(%arg0: i32) -> (i32, i32, i32) {
    %c0_i32 = arith.constant 0 : i32
    %c0_i32_0 = arith.constant 0 : i32
    %c0_i32_1 = arith.constant 0 : i32
    return %arg0, %c0_i32, %c0_i32_0 : i32, i32, i32
  }
}

module attributes {stable_mosaic.version = 11 : i64} {
  func.func @_cross_view_attention_kernel(%arg0: i32, %arg1: memref<1x16x128xbf16, #tpu.memory_space<vmem>>, %arg2: memref<1x16x128xbf16, #tpu.memory_space<vmem>>, %arg3: memref<128x128xbf16, #tpu.memory_space<vmem>>, %arg4: memref<128x128xbf16, #tpu.memory_space<vmem>>, %arg5: memref<128x128xbf16, #tpu.memory_space<vmem>>, %arg6: memref<128x128xbf16, #tpu.memory_space<vmem>>, %arg7: memref<128x128xbf16, #tpu.memory_space<vmem>>, %arg8: memref<4x128xf32, #tpu.memory_space<vmem>>, %arg9: memref<1x16x128xf32, #tpu.memory_space<vmem>>, %arg10: memref<1x16x128xf32, #tpu.memory_space<vmem>>) attributes {dimension_semantics = [#tpu.dimension_semantics<parallel>], iteration_bounds = array<i64: 2>, scalar_prefetch = 0 : i64, scratch_operands = 0 : i64, tpu.core_type = #tpu.core_type<tc>, window_params = [{transform_indices = @transform_0, window_bounds = array<i64: 1, 16, 128>}, {transform_indices = @transform_1, window_bounds = array<i64: 1, 16, 128>}, {pipeline_mode = #tpu.pipeline_mode<synchronous>, transform_indices = @transform_2, window_bounds = array<i64: 128, 128>}, {pipeline_mode = #tpu.pipeline_mode<synchronous>, transform_indices = @transform_3, window_bounds = array<i64: 128, 128>}, {pipeline_mode = #tpu.pipeline_mode<synchronous>, transform_indices = @transform_4, window_bounds = array<i64: 128, 128>}, {pipeline_mode = #tpu.pipeline_mode<synchronous>, transform_indices = @transform_5, window_bounds = array<i64: 128, 128>}, {pipeline_mode = #tpu.pipeline_mode<synchronous>, transform_indices = @transform_6, window_bounds = array<i64: 128, 128>}, {pipeline_mode = #tpu.pipeline_mode<synchronous>, transform_indices = @transform_7, window_bounds = array<i64: 4, 128>}, {transform_indices = @transform_8, window_bounds = array<i64: 1, 16, 128>}, {transform_indices = @transform_9, window_bounds = array<i64: 1, 16, 128>}]} {
    %c0 = arith.constant 0 : index
    %c0_0 = arith.constant 0 : index
    %0 = vector.load %arg8[%c0, %c0_0] : memref<4x128xf32, #tpu.memory_space<vmem>>, vector<1x128xf32>
    %c1 = arith.constant 1 : index
    %c0_1 = arith.constant 0 : index
    %1 = vector.load %arg8[%c1, %c0_1] : memref<4x128xf32, #tpu.memory_space<vmem>>, vector<1x128xf32>
    %c2 = arith.constant 2 : index
    %c0_2 = arith.constant 0 : index
    %2 = vector.load %arg8[%c2, %c0_2] : memref<4x128xf32, #tpu.memory_space<vmem>>, vector<1x128xf32>
    %c3 = arith.constant 3 : index
    %c0_3 = arith.constant 0 : index
    %3 = vector.load %arg8[%c3, %c0_3] : memref<4x128xf32, #tpu.memory_space<vmem>>, vector<1x128xf32>
    %c0_4 = arith.constant 0 : index
    %c0_5 = arith.constant 0 : index
    %c0_6 = arith.constant 0 : index
    %4 = vector.load %arg1[%c0_4, %c0_5, %c0_6] : memref<1x16x128xbf16, #tpu.memory_space<vmem>>, vector<1x16x128xbf16>
    %5 = vector.shape_cast %4 : vector<1x16x128xbf16> to vector<16x128xbf16>
    %c0_7 = arith.constant 0 : index
    %c0_8 = arith.constant 0 : index
    %c0_9 = arith.constant 0 : index
    %6 = vector.load %arg2[%c0_7, %c0_8, %c0_9] : memref<1x16x128xbf16, #tpu.memory_space<vmem>>, vector<1x16x128xbf16>
    %7 = vector.shape_cast %6 : vector<1x16x128xbf16> to vector<16x128xbf16>
    %8 = tpu.concatenate %5, %7 in 0 : vector<16x128xbf16>, vector<16x128xbf16> -> vector<32x128xbf16>
    %c0_10 = arith.constant 0 : index
    %c0_11 = arith.constant 0 : index
    %9 = vector.load %arg3[%c0_10, %c0_11] : memref<128x128xbf16, #tpu.memory_space<vmem>>, vector<128x128xbf16>
    %cst = arith.constant dense<0.000000e+00> : vector<32x128xf32>
    %10 = tpu.matmul %8, %9, %cst {dimension_numbers = #tpu.dot_dimension_numbers<[1], [0], [0], [1], [0, 0, 1, 1], [], []>} : vector<32x128xbf16>, vector<128x128xbf16>, vector<32x128xf32> -> vector<32x128xf32>
    %11 = vector.broadcast %0 : vector<1x128xf32> to vector<32x128xf32>
    %12 = arith.addf %10, %11 : vector<32x128xf32>
    %13 = arith.truncf %12 : vector<32x128xf32> to vector<32x128xbf16>
    %c0_12 = arith.constant 0 : index
    %c0_13 = arith.constant 0 : index
    %14 = vector.load %arg4[%c0_12, %c0_13] : memref<128x128xbf16, #tpu.memory_space<vmem>>, vector<128x128xbf16>
    %cst_14 = arith.constant dense<0.000000e+00> : vector<32x128xf32>
    %15 = tpu.matmul %8, %14, %cst_14 {dimension_numbers = #tpu.dot_dimension_numbers<[1], [0], [0], [1], [0, 0, 1, 1], [], []>} : vector<32x128xbf16>, vector<128x128xbf16>, vector<32x128xf32> -> vector<32x128xf32>
    %16 = vector.broadcast %1 : vector<1x128xf32> to vector<32x128xf32>
    %17 = arith.addf %15, %16 : vector<32x128xf32>
    %18 = arith.truncf %17 : vector<32x128xf32> to vector<32x128xbf16>
    %c0_15 = arith.constant 0 : index
    %c0_16 = arith.constant 0 : index
    %19 = vector.load %arg5[%c0_15, %c0_16] : memref<128x128xbf16, #tpu.memory_space<vmem>>, vector<128x128xbf16>
    %cst_17 = arith.constant dense<0.000000e+00> : vector<32x128xf32>
    %20 = tpu.matmul %8, %19, %cst_17 {dimension_numbers = #tpu.dot_dimension_numbers<[1], [0], [0], [1], [0, 0, 1, 1], [], []>} : vector<32x128xbf16>, vector<128x128xbf16>, vector<32x128xf32> -> vector<32x128xf32>
    %21 = vector.broadcast %2 : vector<1x128xf32> to vector<32x128xf32>
    %22 = arith.addf %20, %21 : vector<32x128xf32>
    %23 = arith.truncf %22 : vector<32x128xf32> to vector<32x128xbf16>
    %c0_18 = arith.constant 0 : index
    %c0_19 = arith.constant 0 : index
    %24 = vector.load %arg6[%c0_18, %c0_19] : memref<128x128xbf16, #tpu.memory_space<vmem>>, vector<128x128xbf16>
    %cst_20 = arith.constant dense<0.000000e+00> : vector<16x128xf32>
    %25 = tpu.matmul %5, %24, %cst_20 {dimension_numbers = #tpu.dot_dimension_numbers<[1], [0], [0], [1], [0, 0, 1, 1], [], []>} : vector<16x128xbf16>, vector<128x128xbf16>, vector<16x128xf32> -> vector<16x128xf32>
    %c0_21 = arith.constant 0 : index
    %c0_22 = arith.constant 0 : index
    %26 = vector.load %arg7[%c0_21, %c0_22] : memref<128x128xbf16, #tpu.memory_space<vmem>>, vector<128x128xbf16>
    %cst_23 = arith.constant dense<0.000000e+00> : vector<16x128xf32>
    %27 = tpu.matmul %7, %26, %cst_23 {dimension_numbers = #tpu.dot_dimension_numbers<[1], [0], [0], [1], [0, 0, 1, 1], [], []>} : vector<16x128xbf16>, vector<128x128xbf16>, vector<16x128xf32> -> vector<16x128xf32>
    %28 = arith.addf %25, %27 : vector<16x128xf32>
    %29 = vector.broadcast %3 : vector<1x128xf32> to vector<16x128xf32>
    %30 = arith.addf %28, %29 : vector<16x128xf32>
    %cst_24 = arith.constant 0.000000e+00 : f32
    %31 = vector.broadcast %cst_24 : f32 to vector<16x128xf32>
    %32 = arith.maximumf %30, %31 : vector<16x128xf32>
    %33 = vector.shape_cast %32 : vector<16x128xf32> to vector<1x16x128xf32>
    %34 = vector.extract_strided_slice %13 {offsets = [0, 0], sizes = [16, 128], strides = [1, 1]} : vector<32x128xbf16> to vector<16x128xbf16>
    %35 = vector.shape_cast %34 : vector<16x128xbf16> to vector<1x16x128xbf16>
    %36 = vector.extract_strided_slice %13 {offsets = [16, 0], sizes = [16, 128], strides = [1, 1]} : vector<32x128xbf16> to vector<16x128xbf16>
    %37 = vector.shape_cast %36 : vector<16x128xbf16> to vector<1x16x128xbf16>
    %38 = vector.extract_strided_slice %18 {offsets = [0, 0], sizes = [16, 128], strides = [1, 1]} : vector<32x128xbf16> to vector<16x128xbf16>
    %39 = vector.shape_cast %38 : vector<16x128xbf16> to vector<1x16x128xbf16>
    %40 = vector.extract_strided_slice %18 {offsets = [16, 0], sizes = [16, 128], strides = [1, 1]} : vector<32x128xbf16> to vector<16x128xbf16>
    %41 = vector.shape_cast %40 : vector<16x128xbf16> to vector<1x16x128xbf16>
    %42 = vector.extract_strided_slice %23 {offsets = [0, 0], sizes = [16, 128], strides = [1, 1]} : vector<32x128xbf16> to vector<16x128xbf16>
    %43 = vector.shape_cast %42 : vector<16x128xbf16> to vector<1x16x128xbf16>
    %44 = vector.extract_strided_slice %23 {offsets = [16, 0], sizes = [16, 128], strides = [1, 1]} : vector<32x128xbf16> to vector<16x128xbf16>
    %45 = vector.shape_cast %44 : vector<16x128xbf16> to vector<1x16x128xbf16>
    %46 = tpu.iota {dimensions = array<i32: 2>} : vector<1x1x16xi32>
    %c8_i32 = arith.constant 8 : i32
    %47 = vector.broadcast %c8_i32 : i32 to vector<1x1x16xi32>
    %48 = arith.cmpi slt, %46, %47 : vector<1x1x16xi32>
    %cst_25 = arith.constant 0.000000e+00 : f32
    %cst_26 = arith.constant -1.000000e+30 : f32
    %49 = vector.broadcast %cst_25 : f32 to vector<1x1x16xf32>
    %50 = vector.broadcast %cst_26 : f32 to vector<1x1x16xf32>
    %51 = arith.select %48, %49, %50 : vector<1x1x16xi1>, vector<1x1x16xf32>
    "tpu.trace_start"() <{level = 10 : i32, message = "bqd,bkd->bqk"}> : () -> ()
    %cst_27 = arith.constant dense<0.000000e+00> : vector<1x16x16xf32>
    %52 = tpu.matmul %35, %41, %cst_27 {dimension_numbers = #tpu.dot_dimension_numbers<[2], [2], [1], [1], [0, 0, 0, 1, 1, 1], [0], [0]>} : vector<1x16x128xbf16>, vector<1x16x128xbf16>, vector<1x16x16xf32> -> vector<1x16x16xf32>
    "tpu.trace_stop"() : () -> ()
    %53 = vector.broadcast %51 : vector<1x1x16xf32> to vector<1x16x16xf32>
    %54 = arith.addf %52, %53 : vector<1x16x16xf32>
    %cst_28 = arith.constant dense<0xFF800000> : vector<1x16xf32>
    %55 = vector.multi_reduction <maximumf>, %54, %cst_28 [2] : vector<1x16x16xf32> to vector<1x16xf32>
    %56 = vector.shape_cast %55 : vector<1x16xf32> to vector<1x16x1xf32>
    %57 = vector.broadcast %56 : vector<1x16x1xf32> to vector<1x16x16xf32>
    %58 = arith.subf %54, %57 : vector<1x16x16xf32>
    %59 = math.exp %58 : vector<1x16x16xf32>
    %cst_29 = arith.constant dense<0.000000e+00> : vector<1x16xf32>
    %60 = vector.multi_reduction <add>, %59, %cst_29 [2] : vector<1x16x16xf32> to vector<1x16xf32>
    %61 = vector.shape_cast %60 : vector<1x16xf32> to vector<1x16x1xf32>
    %62 = arith.truncf %59 : vector<1x16x16xf32> to vector<1x16x16xbf16>
    "tpu.trace_start"() <{level = 10 : i32, message = "bqk,bkd->bqd"}> : () -> ()
    %cst_30 = arith.constant dense<0.000000e+00> : vector<1x16x128xf32>
    %63 = tpu.matmul %62, %43, %cst_30 {dimension_numbers = #tpu.dot_dimension_numbers<[2], [1], [1], [2], [0, 0, 0, 1, 1, 2], [0], [0]>} : vector<1x16x16xbf16>, vector<1x16x128xbf16>, vector<1x16x128xf32> -> vector<1x16x128xf32>
    "tpu.trace_stop"() : () -> ()
    %64 = tpu.reciprocal %61 {approx = true} : vector<1x16x1xf32> -> vector<1x16x1xf32>
    %cst_31 = arith.constant 0.176776692 : f32
    %65 = vector.broadcast %cst_31 : f32 to vector<1x16x1xf32>
    %66 = arith.mulf %65, %64 : vector<1x16x1xf32>
    %67 = vector.broadcast %66 : vector<1x16x1xf32> to vector<1x16x128xf32>
    %68 = arith.mulf %63, %67 : vector<1x16x128xf32>
    %69 = arith.addf %68, %33 : vector<1x16x128xf32>
    %c0_32 = arith.constant 0 : index
    %c0_33 = arith.constant 0 : index
    %c0_34 = arith.constant 0 : index
    %70 = vector.load %arg9[%c0_32, %c0_33, %c0_34] : memref<1x16x128xf32, #tpu.memory_space<vmem>>, vector<1x16x128xf32>
    tpu.vector_store %arg9[%c0_32, %c0_33, %c0_34], %69 {strides = array<i32>} : memref<1x16x128xf32, #tpu.memory_space<vmem>>, vector<1x16x128xf32>,
    "tpu.trace_start"() <{level = 10 : i32, message = "bqd,bkd->bqk"}> : () -> ()
    %cst_35 = arith.constant dense<0.000000e+00> : vector<1x16x16xf32>
    %71 = tpu.matmul %37, %39, %cst_35 {dimension_numbers = #tpu.dot_dimension_numbers<[2], [2], [1], [1], [0, 0, 0, 1, 1, 1], [0], [0]>} : vector<1x16x128xbf16>, vector<1x16x128xbf16>, vector<1x16x16xf32> -> vector<1x16x16xf32>
    "tpu.trace_stop"() : () -> ()
    %72 = vector.broadcast %51 : vector<1x1x16xf32> to vector<1x16x16xf32>
    %73 = arith.addf %71, %72 : vector<1x16x16xf32>
    %cst_36 = arith.constant dense<0xFF800000> : vector<1x16xf32>
    %74 = vector.multi_reduction <maximumf>, %73, %cst_36 [2] : vector<1x16x16xf32> to vector<1x16xf32>
    %75 = vector.shape_cast %74 : vector<1x16xf32> to vector<1x16x1xf32>
    %76 = vector.broadcast %75 : vector<1x16x1xf32> to vector<1x16x16xf32>
    %77 = arith.subf %73, %76 : vector<1x16x16xf32>
    %78 = math.exp %77 : vector<1x16x16xf32>
    %cst_37 = arith.constant dense<0.000000e+00> : vector<1x16xf32>
    %79 = vector.multi_reduction <add>, %78, %cst_37 [2] : vector<1x16x16xf32> to vector<1x16xf32>
    %80 = vector.shape_cast %79 : vector<1x16xf32> to vector<1x16x1xf32>
    %81 = arith.truncf %78 : vector<1x16x16xf32> to vector<1x16x16xbf16>
    "tpu.trace_start"() <{level = 10 : i32, message = "bqk,bkd->bqd"}> : () -> ()
    %cst_38 = arith.constant dense<0.000000e+00> : vector<1x16x128xf32>
    %82 = tpu.matmul %81, %45, %cst_38 {dimension_numbers = #tpu.dot_dimension_numbers<[2], [1], [1], [2], [0, 0, 0, 1, 1, 2], [0], [0]>} : vector<1x16x16xbf16>, vector<1x16x128xbf16>, vector<1x16x128xf32> -> vector<1x16x128xf32>
    "tpu.trace_stop"() : () -> ()
    %83 = tpu.reciprocal %80 {approx = true} : vector<1x16x1xf32> -> vector<1x16x1xf32>
    %cst_39 = arith.constant 0.176776692 : f32
    %84 = vector.broadcast %cst_39 : f32 to vector<1x16x1xf32>
    %85 = arith.mulf %84, %83 : vector<1x16x1xf32>
    %86 = vector.broadcast %85 : vector<1x16x1xf32> to vector<1x16x128xf32>
    %87 = arith.mulf %82, %86 : vector<1x16x128xf32>
    %88 = arith.addf %87, %33 : vector<1x16x128xf32>
    %c0_40 = arith.constant 0 : index
    %c0_41 = arith.constant 0 : index
    %c0_42 = arith.constant 0 : index
    %89 = vector.load %arg10[%c0_40, %c0_41, %c0_42] : memref<1x16x128xf32, #tpu.memory_space<vmem>>, vector<1x16x128xf32>
    tpu.vector_store %arg10[%c0_40, %c0_41, %c0_42], %88 {strides = array<i32>} : memref<1x16x128xf32, #tpu.memory_space<vmem>>, vector<1x16x128xf32>,
    return
  }
  func.func @transform_0(%arg0: i32) -> (i32, i32, i32) {
    %c0_i32 = arith.constant 0 : i32
    %c0_i32_0 = arith.constant 0 : i32
    %c0_i32_1 = arith.constant 0 : i32
    return %arg0, %c0_i32, %c0_i32_0 : i32, i32, i32
  }
  func.func @transform_1(%arg0: i32) -> (i32, i32, i32) {
    %c0_i32 = arith.constant 0 : i32
    %c0_i32_0 = arith.constant 0 : i32
    %c0_i32_1 = arith.constant 0 : i32
    return %arg0, %c0_i32, %c0_i32_0 : i32, i32, i32
  }
  func.func @transform_2(%arg0: i32) -> (i32, i32) {
    %c0_i32 = arith.constant 0 : i32
    %c0_i32_0 = arith.constant 0 : i32
    %c0_i32_1 = arith.constant 0 : i32
    return %c0_i32, %c0_i32_0 : i32, i32
  }
  func.func @transform_3(%arg0: i32) -> (i32, i32) {
    %c0_i32 = arith.constant 0 : i32
    %c0_i32_0 = arith.constant 0 : i32
    %c0_i32_1 = arith.constant 0 : i32
    return %c0_i32, %c0_i32_0 : i32, i32
  }
  func.func @transform_4(%arg0: i32) -> (i32, i32) {
    %c0_i32 = arith.constant 0 : i32
    %c0_i32_0 = arith.constant 0 : i32
    %c0_i32_1 = arith.constant 0 : i32
    return %c0_i32, %c0_i32_0 : i32, i32
  }
  func.func @transform_5(%arg0: i32) -> (i32, i32) {
    %c0_i32 = arith.constant 0 : i32
    %c0_i32_0 = arith.constant 0 : i32
    %c0_i32_1 = arith.constant 0 : i32
    return %c0_i32, %c0_i32_0 : i32, i32
  }
  func.func @transform_6(%arg0: i32) -> (i32, i32) {
    %c0_i32 = arith.constant 0 : i32
    %c0_i32_0 = arith.constant 0 : i32
    %c0_i32_1 = arith.constant 0 : i32
    return %c0_i32, %c0_i32_0 : i32, i32
  }
  func.func @transform_7(%arg0: i32) -> (i32, i32) {
    %c0_i32 = arith.constant 0 : i32
    %c0_i32_0 = arith.constant 0 : i32
    %c0_i32_1 = arith.constant 0 : i32
    return %c0_i32, %c0_i32_0 : i32, i32
  }
  func.func @transform_8(%arg0: i32) -> (i32, i32, i32) {
    %c0_i32 = arith.constant 0 : i32
    %c0_i32_0 = arith.constant 0 : i32
    %c0_i32_1 = arith.constant 0 : i32
    return %arg0, %c0_i32, %c0_i32_0 : i32, i32, i32
  }
  func.func @transform_9(%arg0: i32) -> (i32, i32, i32) {
    %c0_i32 = arith.constant 0 : i32
    %c0_i32_0 = arith.constant 0 : i32
    %c0_i32_1 = arith.constant 0 : i32
    return %arg0, %c0_i32, %c0_i32_0 : i32, i32, i32
  }
}

</mosaic_0001>

<bundles_post_ra>
// kernel: tpu_custom_call.1
= control target key start
LH: loop header
LB: loop body
LE: loop exit
PB: predicated region body
PF: predicated region fallthrough
CT: control target
= control target key end

     0   :  { %s2844_s0 = inlined_call_operand.hbm [shape: bf16[2,16,128], index: 0, kind: input, shape index: {}]   ;;  %s2845_s1 = inlined_call_operand.hbm [shape: bf16[2,16,128], index: 1, kind: input, shape index: {}]   ;;  %s2846_s2 = inlined_call_operand.hbm [shape: bf16[128,128], index: 2, kind: input, shape index: {}]   ;;  %s2847_s3 = inlined_call_operand.hbm [shape: bf16[128,128], index: 3, kind: input, shape index: {}]   ;;  %s2848_s4 = inlined_call_operand.hbm [shape: bf16[128,128], index: 4, kind: input, shape index: {}]   ;;  %s2849_s5 = inlined_call_operand.hbm [shape: bf16[128,128], index: 5, kind: input, shape index: {}]   ;;  %s2850_s6 = inlined_call_operand.hbm [shape: bf16[128,128], index: 6, kind: input, shape index: {}]   ;;  %s2851_s7 = inlined_call_operand.vmem [shape: f32[4,128], index: 7, kind: input, shape index: {}]   ;;  %s2852_s8 = inlined_call_operand.hbm [shape: f32[2,16,128], index: 8, kind: output, shape index: {0}]   ;;  %s2853_s9 = inlined_call_operand.hbm [shape: f32[2,16,128], index: 9, kind: output, shape index: {1}]  }
   0x1   :  { %2862 = sst [smem:[#allocation25_spill]] %s2844_s0 }
   0x2   :  { %2863 = sst [smem:[#allocation26_spill]] %s2846_s2 }
   0x3   :  { %2864 = sst [smem:[#allocation27_spill]] %s2847_s3 }
   0x4   :  { %2865 = sst [smem:[#allocation28_spill]] %s2848_s4 }
   0x5   :  { %2866 = sst [smem:[#allocation29_spill]] %s2849_s5 }
   0x6   :  { %2867 = sst [smem:[#allocation30_spill]] %s2850_s6 }
   0x7   :  { %2868 = sst [smem:[#allocation31_spill]] %s2853_s9 }
   0x8   :  { %15 = vsyncpa [#allocation3], 0 }
   0x9   :  { %17 = vsyncpa [#allocation3 + $0x1], 0 }
   0xa   :  { %18 = vsyncpa [#allocation6], 0 }
   0xb   :  { %20 = vsyncpa [#allocation6 + $0x1], 0 }
   0xc   :  { %21 = vsyncpa [#allocation9], 0 }
   0xd   :  { %22 = vsyncpa [#allocation12], 0 }
   0xe   :  { %23 = vsyncpa [#allocation4], 0 }
   0xf   :  { %25 = vsyncpa [#allocation4 + $0x1], 0 }
  0x10   :  { %26 = vsyncpa [#allocation16], 0 }
  0x11   :  { %28 = vsyncpa [#allocation16 + $0x1], 0  ;;  %s2331_s30 = smov 0   ;;  %s2333_s10 = smov 0  }
  0x12   :  { %s2335_s11 = smov 0   ;;  %s2337_s12 = smov 0  }
  0x13 LB: > { %s2265_s13 = smov [#allocation7]   ;;  %s2352_s15 = sadd.s32 4294967295, %s2263_s12   ;;  %s2263_s12 = sphi %s2337_s12, %s2901_s12   ;;  %s2259_s11 = sphi %s2335_s11, %s2900_s11   ;;  %s2255_s10 = sphi %s2333_s10, %s2899_s10   ;;  %s2251_s30 = sphi %s2331_s30, %s2898_s30  }
  0x14   : > { %s281_s14 = sshll.u32 %s2265_s13, 4  ;;  %p1514_p0 = scmp.ge.s32.totalorder %s2263_s12, 1  ;;  %s2357_s14 = int_to_ptr.vmem [resolvable:$true] %s281_s14 }
  0x15   : > { %p2855_p1 = scmp.eq.s32.totalorder %s2352_s15, 0  ;;  %p269_p2 = scmp.lt.s32.totalorder %s2263_s12, 3 }
  0x16   : > { %s2266_s17 = smov [#allocation8]   ;;  %s2267_s20 = smov [#allocation11]  }
  0x17   : > { %p2359_p3 = pnand %p1514_p0, %p269_p2  ;;  %s294_s18 = sshll.u32 %s2266_s17, 4  ;;  %s2372_s18 = int_to_ptr.vmem [resolvable:$true] %s294_s18 }
  0x18   : > { %s320_s21 = sshll.u32 %s2267_s20, 4  ;;  %s2871_s2 = sld [smem:[#allocation26_spill]]  ;;  %s2374_s21 = int_to_ptr.vmem [resolvable:$true] %s320_s21 }
  0x19   : > { %s2869_s16 = scalar_select %p2359_p3, 1, 0 }
  0x1a   : > { %p1805_p5 = pneg %p2359_p3 }
  0x1c   : > { %p2368_p6 = pnand %p1805_p5, %p2855_p1 }
  0x1e   : > { %s1949_s24 = scalar_lea.hbm %s2871_s2, 1024  ;;  %p2384_p8 = pneg %p2368_p6 }
  0x1f   : > { %p1950_p7 = scmp.ne.s32.totalorder %s2871_s2, %s1949_s24  ;;  %p1956_p11 = scmp.lt.u32.totalorder %s1949_s24, %s2871_s2 }
  0x21   : > { %p1952_p9 = pnand %p2384_p8, %p1950_p7 }
  0x23   : > { %p1953_p10 = pneg %p1952_p9 }
  0x25   : > { %p1958_p12 = pnand %p1956_p11, %p1953_p10 }
  0x27   : > { %1961 = shalt.err (!%p1958_p12)
}
  0x28   : > { %s1962_s13 = scalar_lea.vmem %s2357_s14, 1024  ;;  %p1970_p5 = scmp.lt.s32.totalorder %s2357_s14, %s2357_s14 }
  0x29   : > { %p1963_p13 = scmp.ne.s32.totalorder %s2357_s14, %s1962_s13  ;;  %p1971_p4 = scmp.lt.s32.totalorder %s1962_s13, %s1962_s13 }
  0x2b   : > { %p1965_p0 = pnand %p1963_p13, %p2384_p8  ;;  %p1972_p7 = por %p1971_p4, %p1970_p5 }
  0x2d   : > { %p1966_p2 = pneg %p1965_p0 }
  0x2f   : > { %p1973_p9 = pnand %p1972_p7, %p1966_p2 }
  0x31   : > { %1976 = shalt.err (!%p1973_p9)
}
  0x32   : > { %s2857_s17 = smov 64   ;;  %s2859_s20 = smov 4  }
  0x33   : > { %1808 = dma.hbm_to_vmem [thread:$0]  (!%p2368_p6), %s2871_s2, 1024, %s2357_s14, [#allocation6], %s2857_s17, %s2857_s17, %s2859_s20  }
  0x34   : > { %s2873_s3 = sld [smem:[#allocation27_spill]] }
  0x3a   : > { %s1977_s26 = scalar_lea.hbm %s2873_s3, 1024 }
  0x3b   : > { %p1978_p4 = scmp.ne.s32.totalorder %s2873_s3, %s1977_s26  ;;  %p1984_p12 = scmp.lt.u32.totalorder %s1977_s26, %s2873_s3 }
  0x3d   : > { %p1980_p10 = pnand %p1978_p4, %p2384_p8 }
  0x3f   : > { %p1981_p11 = pneg %p1980_p10 }
  0x41   : > { %p1986_p13 = pnand %p1984_p12, %p1981_p11 }
  0x43   : > { %1989 = shalt.err (!%p1986_p13)
}
  0x44   : > { %s1990_s14 = scalar_lea.vmem %s2372_s18, 1024  ;;  %p1998_p7 = scmp.lt.s32.totalorder %s2372_s18, %s2372_s18 }
  0x45   : > { %p1991_p0 = scmp.ne.s32.totalorder %s2372_s18, %s1990_s14  ;;  %p1999_p9 = scmp.lt.s32.totalorder %s1990_s14, %s1990_s14 }
  0x47   : > { %p1993_p2 = pnand %p1991_p0, %p2384_p8  ;;  %p2000_p4 = por %p1999_p9, %p1998_p7 }
  0x49   : > { %p1994_p5 = pneg %p1993_p2 }
  0x4b   : > { %p2001_p10 = pnand %p2000_p4, %p1994_p5 }
  0x4d   : > { %2004 = shalt.err (!%p2001_p10)
}
  0x4e   : > { %1811 = dma.hbm_to_vmem [thread:$0]  (!%p2368_p6), %s2873_s3, 1024, %s2372_s18, [#allocation9], %s2857_s17, %s2857_s17, %s2859_s20  }
  0x4f   : > { %s2874_s5 = sld [smem:[#allocation29_spill]] }
  0x55   : > { %s2005_s25 = scalar_lea.hbm %s2874_s5, 1024 }
  0x56   : > { %p2006_p11 = scmp.ne.s32.totalorder %s2874_s5, %s2005_s25  ;;  %p2012_p0 = scmp.lt.u32.totalorder %s2005_s25, %s2874_s5 }
  0x58   : > { %p2008_p12 = pnand %p2006_p11, %p2384_p8 }
  0x5a   : > { %p2009_p13 = pneg %p2008_p12 }
  0x5c   : > { %p2014_p2 = pnand %p2012_p0, %p2009_p13 }
  0x5e   : > { %2017 = shalt.err (!%p2014_p2)
}
  0x5f   : > { %s2018_s18 = scalar_lea.vmem %s2374_s21, 1024  ;;  %p2026_p4 = scmp.lt.s32.totalorder %s2374_s21, %s2374_s21 }
  0x60   : > { %p2019_p5 = scmp.ne.s32.totalorder %s2374_s21, %s2018_s18  ;;  %p2027_p10 = scmp.lt.s32.totalorder %s2018_s18, %s2018_s18 }
  0x62   : > { %p2021_p7 = pnand %p2019_p5, %p2384_p8  ;;  %p2028_p11 = por %p2027_p10, %p2026_p4 }
  0x64   : > { %p2022_p9 = pneg %p2021_p7 }
  0x66   : > { %p2029_p12 = pnand %p2028_p11, %p2022_p9 }
  0x68   : > { %2032 = shalt.err (!%p2029_p12)
}
  0x69   : > { %1817 = dma.hbm_to_vmem [thread:$0]  (!%p2368_p6), %s2874_s5, 1024, %s2374_s21, [#allocation12], %s2857_s17, %s2857_s17, %s2859_s20  }
  0x6a   : > { %s2270_s22 = smov [#allocation10]   ;;  %s2271_s24 = smov [#allocation13]  }
  0x6b   : > { %s307_s23 = sshll.u32 %s2270_s22, 4  ;;  %s333_s25 = sshll.u32 %s2271_s24, 4  ;;  %s308_s23 = int_to_ptr.vmem [resolvable:$true] %s307_s23  ;;  %s334_s25 = int_to_ptr.vmem [resolvable:$true] %s333_s25 }
  0x6c   : > { %s2875_s4 = sld [smem:[#allocation28_spill]] }
  0x72   : > { %s2033_s29 = scalar_lea.hbm %s2875_s4, 1024 }
  0x73   : > { %p2034_p13 = scmp.ne.s32.totalorder %s2875_s4, %s2033_s29  ;;  %p2040_p5 = scmp.lt.u32.totalorder %s2033_s29, %s2875_s4 }
  0x75   : > { %p2036_p0 = pnand %p2034_p13, %p2384_p8 }
  0x77   : > { %p2037_p2 = pneg %p2036_p0 }
  0x79   : > { %p2042_p7 = pnand %p2040_p5, %p2037_p2 }
  0x7b   : > { %2045 = shalt.err (!%p2042_p7)
}
  0x7c   : > { %s2046_s21 = scalar_lea.vmem %s308_s23, 1024  ;;  %p2054_p11 = scmp.lt.s32.totalorder %s308_s23, %s308_s23 }
  0x7d   : > { %p2047_p9 = scmp.ne.s32.totalorder %s308_s23, %s2046_s21  ;;  %p2055_p12 = scmp.lt.s32.totalorder %s2046_s21, %s2046_s21 }
  0x7f   : > { %p2049_p4 = pnand %p2047_p9, %p2384_p8  ;;  %p2056_p1 = por %p2055_p12, %p2054_p11 }
  0x81   : > { %p2050_p10 = pneg %p2049_p4 }
  0x83   : > { %p2057_p3 = pnand %p2056_p1, %p2050_p10 }
  0x85   : > { %2060 = shalt.err (!%p2057_p3)
}
  0x86   : > { %1814 = dma.hbm_to_vmem [thread:$0]  (!%p2368_p6), %s2875_s4, 1024, %s308_s23, [#allocation9], %s2857_s17, %s2857_s17, %s2859_s20  }
  0x87   : > { %s2876_s6 = sld [smem:[#allocation30_spill]] }
  0x8d   : > { %s2061_s26 = scalar_lea.hbm %s2876_s6, 1024 }
  0x8e   : > { %p2062_p1 = scmp.ne.s32.totalorder %s2876_s6, %s2061_s26  ;;  %p2068_p0 = scmp.lt.u32.totalorder %s2061_s26, %s2876_s6 }
  0x90   : > { %p2064_p3 = pnand %p2062_p1, %p2384_p8 }
  0x92   : > { %p2065_p13 = pneg %p2064_p3 }
  0x94   : > { %p2070_p2 = pnand %p2068_p0, %p2065_p13 }
  0x96   : > { %2073 = shalt.err (!%p2070_p2)
}
  0x97   : > { %s2074_s14 = scalar_lea.vmem %s334_s25, 1024  ;;  %p2082_p4 = scmp.lt.s32.totalorder %s334_s25, %s334_s25 }
  0x98   : > { %p2075_p5 = scmp.ne.s32.totalorder %s334_s25, %s2074_s14  ;;  %p2083_p10 = scmp.lt.s32.totalorder %s2074_s14, %s2074_s14 }
  0x9a   : > { %p2077_p7 = pnand %p2075_p5, %p2384_p8  ;;  %p2084_p11 = por %p2083_p10, %p2082_p4 }
  0x9c   : > { %p2078_p9 = pneg %p2077_p7 }
  0x9e   : > { %p2085_p12 = pnand %p2084_p11, %p2078_p9 }
  0xa0   : > { %2088 = shalt.err (!%p2085_p12)
}
  0xa1   : > { %1820 = dma.hbm_to_vmem [thread:$0]  (!%p2368_p6), %s2876_s6, 1024, %s334_s25, [#allocation12], %s2857_s17, %s2857_s17, %s2859_s20  }
  0xa2   : > { %s1513_s19 = sadd.s32 4294967294, %s2263_s12   ;;  %s2504_s27 = sadd.s32 1, %s2263_s12  }
  0xa3   : > { %s41_s2 = sadd.s32 1, %s2259_s11  ;;  %s38_s9 = ssub.s32 %s2263_s12, %s2504_s27 }
  0xa4   : > { %p48_p8 = scmp.ne.s32.totalorder %s2259_s11, %s2255_s10  ;;  %p39_p1 = scmp.eq.s32.totalorder %s38_s9, 0 }
  0xa5   : > { %p49_p3 = scmp.eq.s32.totalorder %s2263_s12, 0  ;;  %p54_p13 = scmp.ne.s32.totalorder %s2255_s10, %s2251_s30 }
  0xa6   : > { %p230_p0 = scmp.eq.s32.totalorder %s2352_s15, 1  ;;  %p2878_p5 = scmp.eq.s32.totalorder %s2352_s15, 0 }
  0xa7   : > { %s2516_s22 = scalar_select %p39_p1, %s2259_s11, %s41_s2  }
  0xa8   : > { %p50_p2 = por %p49_p3, %p48_p8  ;;  %p2520_p7 = por %p2878_p5, %p54_p13 }
  0xa9   : > { %2877 = sst [smem:[#allocation24_spill]] %s2516_s22  ;;  %p2524_p6 = por %p230_p0, %p48_p8 }
  0xaa   : > { %p236_p9 = scmp.eq.s32.totalorder %s1513_s19, 1  ;;  %p1840_p4 = scmp.lt.s32.totalorder %s2263_s12, 2 }
  0xab   : > { %s2880_s25 = scalar_select %p2524_p6, 1, 0 }
  0xac   : > { %s350_s26 = sand.u32 1, %s2259_s11   ;;  %p2530_p10 = por %p236_p9, %p54_p13 }
  0xad   : > { %s2534_s29 = sshll.u32 %s350_s26, 3  ;;  %s1593_s13 = sshll.u32 %s2263_s12, 7 }
  0xae   : > { %s2881_s28 = scalar_select %p2530_p10, 1, 0 }
  0xaf   : > { %s2882_s0 = sld [smem:[#allocation25_spill]]  ;;  %s354_s21 = scalar_lea.vmem [#allocation2], %s2534_s29 }
  0xb0   : > { %s361_s19 = sshll.u32 %s354_s21, 4  ;;  %p2543_p11 = pnand %p1840_p4, %p50_p2  ;;  %s2547_s19 = int_to_ptr.vmem [resolvable:$true] %s361_s19 }
  0xb1   : > { %s2552_s18 = scalar_lea.hbm %s2845_s1, %s1593_s13  ;;  %s2554_s14 = scalar_lea.sflag [#allocation3], %s350_s26 }
  0xb2   : > { %p2091_p8 = pneg %p2543_p11 }
  0xb5   : > { %s2540_s23 = scalar_lea.hbm %s2882_s0, %s1593_s13  ;;  %s2094_s4 = scalar_lea.hbm %s2882_s0, 256 }
  0xb6   : > { %s2089_s20 = scalar_lea.hbm %s2540_s23, 128  ;;  %p2095_p13 = scmp.lt.u32.totalorder %s2540_s23, %s2882_s0 }
  0xb7   : > { %p2090_p12 = scmp.ne.s32.totalorder %s2540_s23, %s2089_s20  ;;  %p2096_p0 = scmp.lt.u32.totalorder %s2094_s4, %s2089_s20 }
  0xb8   : > { %p2098_p5 = scmp.lt.u32.totalorder %s2089_s20, %s2540_s23 }
  0xb9   : > { %p2092_p1 = pnand %p2091_p8, %p2090_p12  ;;  %p2097_p2 = por %p2096_p0, %p2095_p13 }
  0xbb   : > { %p2093_p3 = pneg %p2092_p1  ;;  %p2099_p9 = por %p2098_p5, %p2097_p2 }
  0xbd   : > { %p2100_p4 = pnand %p2099_p9, %p2093_p3 }
  0xbf   : > { %2103 = shalt.err (!%p2100_p4)
}
  0xc0   : > { %s2104_s17 = scalar_lea.vmem %s2547_s19, 128  ;;  %s2272_s3 = smov [#allocation2]  }
  0xc1   : > { %p2105_p12 = scmp.ne.s32.totalorder %s2547_s19, %s2104_s17  ;;  %s2109_s26 = sshll.u32 %s2272_s3, 4  ;;  %s2110_s26 = int_to_ptr.vmem [resolvable:$false] %s2109_s26 }
  0xc2   : > { %s2111_s5 = scalar_lea.vmem %s2110_s26, 256  ;;  %p2112_p6 = scmp.lt.s32.totalorder %s2547_s19, %s2110_s26 }
  0xc3   : > { %p2107_p1 = pnand %p2105_p12, %p2091_p8  ;;  %p2113_p13 = scmp.lt.s32.totalorder %s2111_s5, %s2104_s17 }
  0xc5   : > { %p2108_p10 = pneg %p2107_p1  ;;  %p2114_p0 = por %p2113_p13, %p2112_p6 }
  0xc7   : > { %p2115_p2 = pnand %p2114_p0, %p2108_p10 }
  0xc9   : > { %2118 = shalt.err (!%p2115_p2)
}
  0xca   : > { %s2884_s4 = smov 4   ;;  %s2885_s6 = smov 64  }
  0xcb   : > { %1824 = dma.hbm_to_vmem [thread:$0]  (!%p2543_p11), %s2540_s23, 128, %s2547_s19, %s2554_s14, %s2885_s6, %s2885_s6, %s2884_s4  }
  0xcc   : > { %s375_s20 = scalar_lea.vmem [#allocation5], %s2534_s29  ;;  %s371_s9 = sand.u32 1, %s2263_s12  }
  0xcd   : > { %s382_s13 = sshll.u32 %s375_s20, 4  ;;  %s2589_s21 = scalar_lea.sflag [#allocation6], %s371_s9  ;;  %s2587_s13 = int_to_ptr.vmem [resolvable:$true] %s382_s13 }
  0xce   : > { %s2119_s17 = scalar_lea.hbm %s2552_s18, 128  ;;  %s2124_s5 = scalar_lea.hbm %s2845_s1, 256 }
  0xcf   : > { %p2120_p6 = scmp.ne.s32.totalorder %s2552_s18, %s2119_s17  ;;  %p2125_p5 = scmp.lt.u32.totalorder %s2552_s18, %s2845_s1 }
  0xd0   : > { %p2126_p9 = scmp.lt.u32.totalorder %s2124_s5, %s2119_s17  ;;  %p2128_p12 = scmp.lt.u32.totalorder %s2119_s17, %s2552_s18 }
  0xd1   : > { %p2122_p10 = pnand %p2120_p6, %p2091_p8 }
  0xd2   : > { %p2127_p4 = por %p2126_p9, %p2125_p5 }
  0xd3   : > { %p2123_p3 = pneg %p2122_p10 }
  0xd4   : > { %p2129_p1 = por %p2128_p12, %p2127_p4 }
  0xd6   : > { %p2130_p13 = pnand %p2129_p1, %p2123_p3 }
  0xd8   : > { %2133 = shalt.err (!%p2130_p13)
}
  0xd9   : > { %s2134_s29 = scalar_lea.vmem %s2587_s13, 128  ;;  %s2273_s23 = smov [#allocation5]  }
  0xda   : > { %p2135_p0 = scmp.ne.s32.totalorder %s2587_s13, %s2134_s29  ;;  %s2139_s19 = sshll.u32 %s2273_s23, 4  ;;  %s2140_s19 = int_to_ptr.vmem [resolvable:$false] %s2139_s19 }
  0xdb   : > { %s2141_s0 = scalar_lea.vmem %s2140_s19, 256  ;;  %p2142_p10 = scmp.lt.s32.totalorder %s2587_s13, %s2140_s19 }
  0xdc   : > { %p2137_p2 = pnand %p2135_p0, %p2091_p8  ;;  %p2143_p5 = scmp.lt.s32.totalorder %s2141_s0, %s2134_s29 }
  0xde   : > { %p2138_p6 = pneg %p2137_p2  ;;  %p2144_p9 = por %p2143_p5, %p2142_p10 }
  0xe0   : > { %p2145_p4 = pnand %p2144_p9, %p2138_p6 }
  0xe2   : > { %2148 = shalt.err (!%p2145_p4)
}
  0xe3   : > { %1827 = dma.hbm_to_vmem [thread:$0]  (!%p2543_p11), %s2552_s18, 128, %s2587_s13, %s2589_s21, %s2885_s6, %s2885_s6, %s2884_s4  }
  0xe4   : > { %p2886_p8 = scmp.ne.s32.totalorder %s2869_s16, 0 }
  0xe5   : > { %s2621_s22 = sand.u32 (!%p2886_p8), 1, %s2255_s10  }
  0xe6   : > { %394 = sbr.rel (%p2886_p8) target bundleno = 1505 (0x5e1), region = 52  ;;  %s1528_s14 = sshll.u32 (!%p2886_p8), %s2621_s22, 3 }
  0xe7   : > { %s397_s20 = scalar_lea.sflag (!%p2886_p8), [#allocation3], %s2621_s22  ;;  %s2625_s9 = scalar_lea.vmem (!%p2886_p8), [#allocation2], %s1528_s14 }
  0xed   : > { %2222 = dma.done.wait (%p2520_p7), %s397_s20, 128  }
  0xee   : > { %2224 = vsyncadd (%p2520_p7), %s397_s20, 4294967168  ;;  %s405_s2 = sand.u32 1, %s2352_s15   ;;  %s2632_s18 = scalar_lea.vmem [#allocation5], %s1528_s14 }
  0xef   : > { %s406_s16 = scalar_lea.sflag [#allocation6], %s405_s2 }
  0xf0   : > { %2226 = dma.done.wait (%p2520_p7), %s406_s16, 128  }
  0xf1   : > { %2228 = vsyncadd (%p2520_p7), %s406_s16, 4294967168  ;;  %p2887_p11 = scmp.eq.s32.totalorder %s2352_s15, 0 }
  0xf3   : > { %2230 = dma.done.wait (%p2887_p11), [#allocation6], 1024   ;;  %p2888_p3 = pmov %p2887_p11 }
  0xf5   : > { %2232 = vsyncadd (%p2888_p3), [#allocation6], 4294966272  ;;  %p2889_p12 = pmov %p2888_p3 }
  0xf6   : > { %p2890_p1 = pmov %p2888_p3 }
  0xf7   : > { %2234 = dma.done.wait (%p2889_p12), [#allocation9], 2048  }
  0xf8   : > { %2236 = vsyncadd (%p2890_p1), [#allocation9], 4294965248  ;;  %p2891_p13 = pmov %p2890_p1 }
  0xf9   : > { %p2892_p0 = pmov %p2890_p1 }
  0xfa   : > { %2238 = dma.done.wait (%p2891_p13), [#allocation12], 2048  }
  0xfb   : > { %2240 = vsyncadd (%p2892_p0), [#allocation12], 4294965248  ;;  %v1891_v0 = vld [vmem:[#allocation8] sm:$0xff]   ;;  %v1893_v2 = vld [vmem:[#allocation8 + $0x8] sm:$0xff]   ;;  %v2274_v20 = vmov 0.0   ;;  %vm2275_vm0 = vmmov 0  }
  0xfc   : > { %v1892_v1 = vld [vmem:[#allocation7] sm:$0xff]   ;;  %1673 = vmatprep.subr.bf16.mxu1 %v1891_v0  ;;  %v1894_v3 = vld [vmem:[#allocation7 + $0x8] sm:$0xff]   ;;  %v1895_v4 = vld [vmem:[#allocation8 + $0x10] sm:$0xff]   ;;  %vm1115_vm2 = vcmask 130048   ;;  %s1535_s5 = sshll.u32 %s2621_s22, 4  ;;  %s1595_s19 = sshll.u32 %s2352_s15, 8 }
  0xfd   : > { %1674 = vmatpush3.bf16.msra.mxu1 %v1891_v0  ;;  %1653 = vmatprep.subr.bf16.mxu0 %v1892_v1  ;;  %v1896_v5 = vld [vmem:[#allocation7 + $0x10] sm:$0xff]   ;;  %v1897_v6 = vld [vmem:[#allocation8 + $0x18] sm:$0xff]   ;;  %v1899_v8 = vld [vmem:[#allocation8 + $0x20] sm:$0xff]   ;;  %s2737_s29 = scalar_lea.vmem [#allocation14], %s1535_s5  ;;  %s2757_s20 = scalar_lea.hbm %s2852_s8, %s1595_s19 }
  0xfe   : > { %1675 = vmatprep.subr.bf16.mxu1 %v1893_v2  ;;  %1654 = vmatpush3.bf16.msra.mxu0 %v1892_v1  ;;  %v1898_v7 = vld [vmem:[#allocation7 + $0x18] sm:$0xff]   ;;  %v1900_v9 = vld [vmem:[#allocation7 + $0x20] sm:$0xff]   ;;  %v1901_v11 = vld [vmem:[#allocation8 + $0x28] sm:$0xff]   ;;  %s1322_s23 = sshll.u32 %s2737_s29, 4  ;;  %p2893_p2 = scmp.ne.s32.totalorder %s2880_s25, 0  ;;  %s2749_s23 = int_to_ptr.vmem [resolvable:$true] %s1322_s23 }
  0xff   : > { %1655 = vmatprep.subr.bf16.mxu0 %v1894_v3  ;;  %v2651_v10 = vld [vmem:[%s2625_s9] sm:$0xff]   ;;  %v1903_v13 = vld [vmem:[#allocation8 + $0x30] sm:$0xff]   ;;  %v1905_v15 = vld [vmem:[#allocation8 + $0x38] sm:$0xff]   ;;  %s1304_s9 = scalar_lea.sflag [#allocation4], %s2621_s22  ;;  %s2149_s2 = scalar_lea.vmem %s2749_s23, 256 }
 0x100   : > { %v1902_v12 = vld [vmem:[#allocation7 + $0x28] sm:$0xff]   ;;  %1689 = vmatprep.mubr.bf16.mxu1 %v2651_v10  ;;  %1669 = vmatprep.mubr.bf16.mxu0 %v2651_v10  ;;  %v1904_v14 = vld [vmem:[#allocation7 + $0x30] sm:$0xff]   ;;  %v1907_v16 = vld [vmem:[#allocation7 + $0x38] sm:$0xff]   ;;  %p2150_p7 = scmp.ne.s32.totalorder %s2749_s23, %s2149_s2  ;;  %s2277_s16 = smov [#allocation14]  }
 0x101   : > { %1676 = vmatpush3.bf16.msra.mxu1 %v1893_v2  ;;  %v1909_v17 = vld [vmem:[#allocation10] sm:$0xff]   ;;  %v2656_v18 = vld [vmem:[%s2632_s18] sm:$0xff]   ;;  %v1910_v21 = vld [vmem:[#allocation10 + $0x8] sm:$0xff]   ;;  %s2153_s18 = sshll.u32 %s2277_s16, 4  ;;  %s2154_s18 = int_to_ptr.vmem [resolvable:$false] %s2153_s18 }
 0x102   : > { %1677 = vmatprep.subr.bf16.mxu1 %v1895_v4  ;;  %1656 = vmatpush3.bf16.msra.mxu0 %v1894_v3  ;;  %v1917_v19 = vld [vmem:[#allocation13] sm:$0xff]   ;;  %v1918_v22 = vld [vmem:[#allocation13 + $0x8] sm:$0xff]   ;;  %v1911_v23 = vld [vmem:[#allocation10 + $0x10] sm:$0xff]   ;;  %p2151_p6 = pnand %p2150_p7, %p2893_p2  ;;  %s2155_s24 = scalar_lea.vmem %s2154_s18, 512 }
 0x103   : > { %1657 = vmatprep.subr.bf16.mxu0 %v1896_v5  ;;  %v1920_v24 = vld [vmem:[#allocation13 + $0x10] sm:$0xff]   ;;  %v1912_v25 = vld [vmem:[#allocation10 + $0x18] sm:$0xff]   ;;  %v1913_v27 = vld [vmem:[#allocation10 + $0x20] sm:$0xff]   ;;  %p2156_p5 = scmp.lt.s32.totalorder %s2749_s23, %s2154_s18  ;;  %p2157_p9 = scmp.lt.s32.totalorder %s2155_s24, %s2149_s2 }
 0x104   : > { %v1922_v26 = vld [vmem:[#allocation13 + $0x18] sm:$0xff]   ;;  %v1924_v28 = vld [vmem:[#allocation13 + $0x20] sm:$0xff]   ;;  %v1914_v29 = vld [vmem:[#allocation10 + $0x28] sm:$0xff]   ;;  %p2152_p10 = pneg %p2151_p6 }
 0x105   : > { %1678 = vmatpush3.bf16.msra.mxu1 %v1895_v4  ;;  %v1926_v30 = vld [vmem:[#allocation13 + $0x28] sm:$0xff]   ;;  %v1915_v31 = vld [vmem:[#allocation10 + $0x30] sm:$0xff]   ;;  %v1916_v33 = vld [vmem:[#allocation10 + $0x38] sm:$0xff]   ;;  %p2158_p4 = por %p2157_p9, %p2156_p5 }
 0x106   : > { %1679 = vmatprep.subr.bf16.mxu1 %v1897_v6  ;;  %1658 = vmatpush3.bf16.msra.mxu0 %v1896_v5  ;;  %v1928_v32 = vld [vmem:[#allocation13 + $0x30] sm:$0xff]   ;;  %v1930_v34 = vld [vmem:[#allocation13 + $0x38] sm:$0xff]   ;;  %v1919_v35 = vld [vmem:[#allocation11] sm:$0xff]  }
 0x107   : > { %1659 = vmatprep.subr.bf16.mxu0 %v1898_v7  ;;  %v1921_v36 = vld [vmem:[#allocation11 + $0x8] sm:$0xff]   ;;  %v1923_v37 = vld [vmem:[#allocation11 + $0x10] sm:$0xff]   ;;  %v1925_v38 = vld [vmem:[#allocation11 + $0x18] sm:$0xff]   ;;  %p2159_p8 = pnand %p2158_p4, %p2152_p10 }
 0x108   : > { %v1927_v39 = vld [vmem:[#allocation11 + $0x20] sm:$0xff]   ;;  %v1929_v40 = vld [vmem:[#allocation11 + $0x28] sm:$0xff]   ;;  %v1931_v41 = vld [vmem:[#allocation11 + $0x30] sm:$0xff]  }
 0x109   : > { %1680 = vmatpush3.bf16.msra.mxu1 %v1897_v6  ;;  %v1932_v42 = vld [vmem:[#allocation11 + $0x38] sm:$0xff]   ;;  %v1548_v43 = vld [vmem:[%s2851_s7 + $0x1] ss:$0 sm:$0xff]  ;;  %v1539_v44 = vld [vmem:[%s2851_s7] ss:$0 sm:$0xff] }
 0x10a   : > { %1681 = vmatprep.subr.bf16.mxu1 %v1899_v8  ;;  %1660 = vmatpush3.bf16.msra.mxu0 %v1898_v7  ;;  %v1557_v1 = vld [vmem:[%s2851_s7 + $0x2] ss:$0 sm:$0xff] }
 0x10b   : > { %1661 = vmatprep.subr.bf16.mxu0 %v1900_v9 }
 0x10d   : > { %1682 = vmatpush3.bf16.msra.mxu1 %v1899_v8 }
 0x10e   : > { %1683 = vmatprep.subr.bf16.mxu1 %v1901_v11  ;;  %1662 = vmatpush3.bf16.msra.mxu0 %v1900_v9 }
 0x10f   : > { %1663 = vmatprep.subr.bf16.mxu0 %v1902_v12 }
 0x111   : > { %1684 = vmatpush3.bf16.msra.mxu1 %v1901_v11 }
 0x112   : > { %1685 = vmatprep.subr.bf16.mxu1 %v1903_v13  ;;  %1664 = vmatpush3.bf16.msra.mxu0 %v1902_v12 }
 0x113   : > { %1665 = vmatprep.subr.bf16.mxu0 %v1904_v14 }
 0x115   : > { %1686 = vmatpush3.bf16.msra.mxu1 %v1903_v13 }
 0x116   : > { %1687 = vmatprep.subr.bf16.mxu1 %v1905_v15  ;;  %1666 = vmatpush3.bf16.msra.mxu0 %v1904_v14 }
 0x117   : > { %1667 = vmatprep.subr.bf16.mxu0 %v1907_v16 }
 0x119   : > { %1688 = vmatpush3.bf16.msra.mxu1 %v1905_v15 }
 0x11a   : > { %1668 = vmatpush3.bf16.msra.mxu0 %v1907_v16  ;;  %1713 = vmatprep.subr.bf16.mxu1 %v2274_v20 }
 0x11b   : > { %1693 = vmatprep.subr.bf16.mxu0 %v1909_v17 }
 0x11c   : > { %1690 = vmatmul.mubr.bf16.vlgmr.msra.gmra.mrb[0].mxu1 %v2656_v18 }
 0x11d   : > { %1670 = vmatmul.mubr.bf16.vlgmr.msra.gmra.mrb[0].mxu0 %v2656_v18  ;;  %1714 = vmatpush3.bf16.msra.mxu1 %v1917_v19 }
 0x11e   : > { %1694 = vmatpush3.bf16.msra.mxu0 %v1909_v17  ;;  %1709 = vmatprep.mubr.bf16.mxu0 %v2651_v10 }
 0x11f   : > { %1695 = vmatprep.subr.bf16.mxu0 %v1910_v21  ;;  %1715 = vmatprep.subr.bf16.mxu1 %v2274_v20 }
 0x120   : > { %1729 = vmatprep.mubr.msk.bf16.mxu1 %vm2275_vm0, %v2274_v20 }
 0x121   : > { %1716 = vmatpush3.bf16.msra.mxu1 %v1918_v22 }
 0x122   : > { %1696 = vmatpush3.bf16.msra.mxu0 %v1910_v21  ;;  %1717 = vmatprep.subr.bf16.mxu1 %v2274_v20 }
 0x123   : > { %1697 = vmatprep.subr.bf16.mxu0 %v1911_v23 }
 0x125   : > { %1718 = vmatpush3.bf16.msra.mxu1 %v1920_v24 }
 0x126   : > { %1698 = vmatpush3.bf16.msra.mxu0 %v1911_v23  ;;  %1719 = vmatprep.subr.bf16.mxu1 %v2274_v20 }
 0x127   : > { %1699 = vmatprep.subr.bf16.mxu0 %v1912_v25 }
 0x129   : > { %1720 = vmatpush3.bf16.msra.mxu1 %v1922_v26 }
 0x12a   : > { %1700 = vmatpush3.bf16.msra.mxu0 %v1912_v25  ;;  %1721 = vmatprep.subr.bf16.mxu1 %v2274_v20  ;;  %v1070_v25 = vlaneseq }
 0x12b   : > { %1701 = vmatprep.subr.bf16.mxu0 %v1913_v27 }
 0x12c   : > { %v1071_v26 = vand.u32 127, %v1070_v25 }
 0x12d   : > { %1722 = vmatpush3.bf16.msra.mxu1 %v1924_v28 }
 0x12e   : > { %1702 = vmatpush3.bf16.msra.mxu0 %v1913_v27  ;;  %1723 = vmatprep.subr.bf16.mxu1 %v2274_v20  ;;  %vm1072_vm1 = vcmp.lt.s32.totalorder %v1071_v26, 8  ;;  %v2276_v27 = vmov -1e+30  }
 0x12f   : > { %1703 = vmatprep.subr.bf16.mxu0 %v1914_v29  ;;  %v1073_v28 = vsel %vm1072_vm1, 0.0, %v2276_v27 }
 0x131   : > { %1724 = vmatpush3.bf16.msra.mxu1 %v1926_v30 }
 0x132   : > { %1704 = vmatpush3.bf16.msra.mxu0 %v1914_v29  ;;  %1725 = vmatprep.subr.bf16.mxu1 %v2274_v20 }
 0x133   : > { %1705 = vmatprep.subr.bf16.mxu0 %v1915_v31 }
 0x135   : > { %1726 = vmatpush3.bf16.msra.mxu1 %v1928_v32 }
 0x136   : > { %1706 = vmatpush3.bf16.msra.mxu0 %v1915_v31  ;;  %1727 = vmatprep.subr.bf16.mxu1 %v2274_v20 }
 0x137   : > { %1707 = vmatprep.subr.bf16.mxu0 %v1916_v33 }
 0x139   : > { %1728 = vmatpush3.bf16.msra.mxu1 %v1930_v34 }
 0x13a   : > { %1708 = vmatpush3.bf16.msra.mxu0 %v1916_v33  ;;  %1753 = vmatprep.subr.bf16.mxu1 %v2274_v20 }
 0x13b   : > { %1733 = vmatprep.subr.bf16.mxu0 %v2274_v20 }
 0x13c   : > { %1730 = vmatmul.mubr.bf16.vlgmr.msra.gmra.mrb[4].mxu1 %v2656_v18 }
 0x13d   : > { %1710 = vmatmul.mubr.bf16.vlgmr.msra.gmra.mrb[4].mxu0 %v2656_v18  ;;  %1755 = vmatprep.mubr.msk.bf16.mxu1 %vm2275_vm0, %v2274_v20  ;;  %v1582_v18 = vld [vmem:[%s2851_s7 + $0x3] ss:$0 sm:$0xff] }
 0x13e   : > { %1734 = vmatpush3.bf16.msra.mxu0 %v1919_v35  ;;  %1749 = vmatprep.mubr.msk.bf16.mxu0 %vm2275_vm0, %v2274_v20 }
 0x13f   : > { %1735 = vmatprep.subr.bf16.mxu0 %v2274_v20 }
 0x142   : > { %1736 = vmatpush3.bf16.msra.mxu0 %v1921_v36 }
 0x143   : > { %1737 = vmatprep.subr.bf16.mxu0 %v2274_v20 }
 0x146   : > { %1738 = vmatpush3.bf16.msra.mxu0 %v1923_v37 }
 0x147   : > { %1739 = vmatprep.subr.bf16.mxu0 %v2274_v20 }
 0x14a   : > { %1740 = vmatpush3.bf16.msra.mxu0 %v1925_v38 }
 0x14b   : > { %1741 = vmatprep.subr.bf16.mxu0 %v2274_v20 }
 0x14e   : > { %1742 = vmatpush3.bf16.msra.mxu0 %v1927_v39 }
 0x14f   : > { %1743 = vmatprep.subr.bf16.mxu0 %v2274_v20 }
 0x152   : > { %1744 = vmatpush3.bf16.msra.mxu0 %v1929_v40 }
 0x153   : > { %1745 = vmatprep.subr.bf16.mxu0 %v2274_v20 }
 0x156   : > { %1746 = vmatpush3.bf16.msra.mxu0 %v1931_v41 }
 0x157   : > { %1747 = vmatprep.subr.bf16.mxu0 %v2274_v20 }
 0x15a   : > { %1748 = vmatpush3.bf16.msra.mxu0 %v1932_v42 }
 0x15d   : > { %1750 = vmatmul.mubr.bf16.vlgmr.msra.gmra.mrb[8].mxu0 %v2651_v10 }
 0x1ef   : > { %v1691_v45 = vpop.f32.mrb[0].mxu1 }
 0x1f0   : > { %v716_v46 = vpop.f32.mrb[1].mxu1  ;;  %v1671_v47 = vpop.f32.mrb[0].mxu0  ;;  %v725_v52 = vadd.f32 %v1691_v45, %v1548_v43 }
 0x1f1   : > { %v2693_v48 = vadd.f32 %v1548_v43, %v716_v46  ;;  %v1692_v49 = vpop.f32.mrb[2].mxu1  ;;  %v2695_v50 = vadd.f32 %v1671_v47, %v1539_v44  ;;  %v597_v51 = vpop.f32.mrb[1].mxu0 }
 0x1f2   : > { %v728_v53 = vadd.f32 %v1692_v49, %v1548_v43  ;;  %v719_v54 = vpop.f32.mrb[3].mxu1  ;;  %v598_v55 = vadd.f32 %v1539_v44, %v597_v51  ;;  %v1672_v56 = vpop.f32.mrb[2].mxu0 }
 0x1f3   : > { %v2697_v57 = vadd.f32 %v1548_v43, %v719_v54  ;;  %v2699_v58 = vadd.f32 %v1672_v56, %v1539_v44  ;;  %v600_v59 = vpop.f32.mrb[3].mxu0 }
 0x1f4   : > { %v732_v60 = vpack.c.bf16 %v728_v53, %v725_v52  ;;  %v601_v61 = vadd.f32 %v1539_v44, %v600_v59 }
 0x1f5   : > { %v731_v62 = vpack.c.bf16 %v2697_v57, %v2693_v48  ;;  %v613_v63 = vpack.c.bf16 %v2699_v58, %v2695_v50 }
 0x1f6   : > { %v612_v0 = vpack.c.bf16 %v601_v61, %v598_v55  ;;  %1754 = vmatpush3.bf16.xpose.msra.mxu1 %v732_v60 }
 0x1f7   : > { %1759 = vmatprep.subr.bf16.mxu1 %v2274_v20 }
 0x1fd   : > { %1756 = vmatmul.mubr.bf16.vlgmr.msra.gmra.mrb[8].mxu1 %v612_v0 }
 0x1fe   : > { %1761 = vmatprep.mubr.msk.bf16.mxu1 %vm2275_vm0, %v2274_v20 }
 0x20f   : > { %v966_v12 = vpop.f32.mrb[4].mxu1 }
 0x210   : > { %v1711_v2 = vpop.f32.mrb[4].mxu0  ;;  %v1731_v13 = vpop.f32.mrb[5].mxu1 }
 0x211   : > { %v844_v3 = vadd.f32 %v1711_v2, %v1557_v1  ;;  %v835_v4 = vpop.f32.mrb[5].mxu0  ;;  %v969_v16 = vpop.f32.mrb[6].mxu1 }
 0x212   : > { %v836_v5 = vadd.f32 %v1557_v1, %v835_v4  ;;  %v1712_v6 = vpop.f32.mrb[6].mxu0  ;;  %v1732_v19 = vpop.f32.mrb[7].mxu1 }
 0x213   : > { %v847_v7 = vadd.f32 %v1712_v6, %v1557_v1  ;;  %v838_v8 = vpop.f32.mrb[7].mxu0 }
 0x214   : > { %v839_v9 = vadd.f32 %v1557_v1, %v838_v8 }
 0x215   : > { %v851_v10 = vpack.c.bf16 %v847_v7, %v844_v3 }
 0x216   : > { %v850_v11 = vpack.c.bf16 %v839_v9, %v836_v5 }
 0x218   : > { %1760 = vmatpush3.bf16.msra.mxu1 %v850_v11 }
 0x219   : > { %1765 = vmatprep.subr.bf16.mxu1 %v2274_v20 }
 0x230   : > { %v1055_v14 = vpop.f32.mrb[8].mxu0 }
 0x231   : > { %v1056_v15 = vadd.f32 %v1055_v14, %v966_v12  ;;  %v1751_v17 = vpop.f32.mrb[9].mxu0 }
 0x232   : > { %v1058_v21 = vpop.f32.mrb[10].mxu0 }
 0x233   : > { %v1059_v22 = vadd.f32 %v1058_v21, %v969_v16  ;;  %v1752_v23 = vpop.f32.mrb[11].mxu0  ;;  %v2729_v49 = vadd.f32 %v1582_v18, %v1056_v15 }
 0x235   : > { %v2715_v24 = vadd.f32 %v1582_v18, %v1059_v22  ;;  %v1068_v53 = vmax.f32 %v2729_v49, 0.0 }
 0x237   : > { %v1069_v16 = vmax.f32 %v2715_v24, 0.0 }
 0x2d0   : > { %v1108_v29 = vpop.f32.mrb[8].mxu1 }
 0x2d1   : > { %v1109_v30 = vadd.f32 %v1108_v29, %v1073_v28  ;;  %v1757_v31 = vpop.f32.mrb[9].mxu1 }
 0x2d2   : > { %v1111_v32 = vpop.f32.mrb[10].mxu1 }
 0x2d3   : > { %v1112_v33 = vadd.f32 %v1111_v32, %v1073_v28  ;;  %v1758_v34 = vpop.f32.mrb[11].mxu1  ;;  %v1116_v35 = vsel %vm1115_vm2, %v1109_v30, -inf }
 0x2d4   : > { %1117 = vmax.xlane.f32.xlu0 %v1116_v35 }
 0x2d5   : > { %v1119_v36 = vsel %vm1115_vm2, %v1112_v33, -inf }
 0x2d8   : > { %1120 = vmax.xlane.f32.xlu0 %v1119_v36 }
 0x361   : > { %v1118_v37 = vpop.xlane.xlu0 %1117 }
 0x362   : > { %v1122_v38 = vsub.f32 %v1109_v30, %v1118_v37 }
 0x364   : > { %v1124_v39 = vmul.f32 1.442695, %v1122_v38 }
 0x365   : > { %v1121_v40 = vpop.xlane.xlu0 %1120 }
 0x366   : > { %1933 = vpow2.f32 %v1124_v39  ;;  %v1123_v41 = vsub.f32 %v1112_v33, %v1121_v40 }
 0x368   : > { %v1126_v42 = vmul.f32 1.442695, %v1123_v41 }
 0x36a   : > { %1935 = vpow2.f32 %v1126_v42 }
 0x370   : > { %v1934_v43 = vpop.eup %1933 }
 0x371   : > { %v1128_v44 = vsel %vm1115_vm2, %v1934_v43, 0.0 }
 0x372   : > { %1129 = vadd.xlane.f32.xlu0 %v1128_v44 }
 0x374   : > { %v1936_v45 = vpop.eup %1935 }
 0x375   : > { %v1134_v46 = vpack.c.bf16 %v1936_v45, %v1934_v43  ;;  %v1131_v1 = vsel %vm1115_vm2, %v1936_v45, 0.0 }
 0x377   : > { %1762 = vmatmul.mubr.msk.bf16.vlgmr.msra.gmra.mrb[12].mxu1 %vm1115_vm2, %v1134_v46 }
 0x378   : > { %1766 = vmatpush3.bf16.xpose.msra.mxu1 %v731_v62  ;;  %1767 = vmatprep.mubr.msk.bf16.mxu1 %vm2275_vm0, %v2274_v20 }
 0x379   : > { %1771 = vmatprep.subr.bf16.mxu1 %v2274_v20 }
 0x37f   : > { %1768 = vmatmul.mubr.bf16.vlgmr.msra.gmra.mrb[16].mxu1 %v613_v63 }
 0x380   : > { %1772 = vmatpush3.bf16.msra.mxu1 %v851_v10  ;;  %1773 = vmatprep.mubr.msk.bf16.mxu1 %vm2275_vm0, %v2274_v20 }
 0x3ff   : > { %v1130_v47 = vpop.xlane.xlu0 %1129 }
 0x400   : > { %1937 = vrcp.f32 %v1130_v47 }
 0x40a   : > { %v1938_v48 = vpop.eup %1937 }
 0x40b   : > { %v1181_v51 = vmul.f32 0.17677669, %v1938_v48 }
 0x44a   : > { %v1172_v52 = vpop.f32.mrb[12].mxu1 }
 0x44b   : > { %v1183_v54 = vmul.f32 %v1181_v51, %v1172_v52  ;;  %v1763_v55 = vpop.f32.mrb[13].mxu1 }
 0x44c   : > { %v1175_v56 = vpop.f32.mrb[14].mxu1 }
 0x44d   : > { %v1185_v50 = vadd.f32 %v1183_v54, %v1068_v53  ;;  %v1764_v57 = vpop.f32.mrb[15].mxu1 }
 0x44f   : > { %1187 = vst [vmem:[%s2737_s29] sm:$0xff] %v1185_v50 }
 0x452   : > { %v1223_v20 = vpop.f32.mrb[16].mxu1 }
 0x453   : > { %v1224_v58 = vadd.f32 %v1223_v20, %v1073_v28  ;;  %v1769_v59 = vpop.f32.mrb[17].mxu1 }
 0x454   : > { %v1226_v60 = vpop.f32.mrb[18].mxu1 }
 0x455   : > { %v1227_v61 = vadd.f32 %v1226_v60, %v1073_v28  ;;  %v1770_v62 = vpop.f32.mrb[19].mxu1  ;;  %v1230_v63 = vsel %vm1115_vm2, %v1224_v58, -inf }
 0x456   : > { %1231 = vmax.xlane.f32.xlu1 %v1230_v63 }
 0x457   : > { %v1233_v0 = vsel %vm1115_vm2, %v1227_v61, -inf }
 0x45a   : > { %1234 = vmax.xlane.f32.xlu1 %v1233_v0 }
 0x45e   : > { %1132 = vadd.xlane.f32.xlu1 %v1131_v1 }
 0x4e3   : > { %v1232_v2 = vpop.xlane.xlu1 %1231 }
 0x4e4   : > { %v1236_v3 = vsub.f32 %v1224_v58, %v1232_v2 }
 0x4e6   : > { %v1238_v4 = vmul.f32 1.442695, %v1236_v3 }
 0x4e7   : > { %v1235_v5 = vpop.xlane.xlu1 %1234 }
 0x4e8   : > { %1939 = vpow2.f32 %v1238_v4  ;;  %v1237_v6 = vsub.f32 %v1227_v61, %v1235_v5 }
 0x4ea   : > { %v1240_v7 = vmul.f32 1.442695, %v1237_v6 }
 0x4eb   : > { %v1133_v8 = vpop.xlane.xlu1 %1132 }
 0x4ec   : > { %1941 = vpow2.f32 %v1240_v7 }
 0x4ed   : > { %1943 = vrcp.f32 %v1133_v8 }
 0x4f2   : > { %v1940_v9 = vpop.eup %1939 }
 0x4f3   : > { %v1242_v10 = vsel %vm1115_vm2, %v1940_v9, 0.0 }
 0x4f4   : > { %1243 = vadd.xlane.f32.xlu0 %v1242_v10 }
 0x4f6   : > { %v1942_v11 = vpop.eup %1941 }
 0x4f7   : > { %v1944_v12 = vpop.eup %1943  ;;  %v1245_v13 = vsel %vm1115_vm2, %v1942_v11, 0.0  ;;  %v1248_v14 = vpack.c.bf16 %v1942_v11, %v1940_v9 }
 0x4f8   : > { %v1182_v15 = vmul.f32 0.17677669, %v1944_v12  ;;  %1246 = vadd.xlane.f32.xlu1 %v1245_v13 }
 0x4f9   : > { %1774 = vmatmul.mubr.msk.bf16.vlgmr.msra.gmra.mrb[20].mxu1 %vm1115_vm2, %v1248_v14 }
 0x4fa   : > { %v1184_v17 = vmul.f32 %v1182_v15, %v1175_v56 }
 0x4fc   : > { %v1186_v18 = vadd.f32 %v1184_v17, %v1069_v16 }
 0x4fe   : > { %1188 = vst [vmem:[%s2737_s29 + $0x8] sm:$0xff] %v1186_v18 }
 0x4ff   : > { %2162 = shalt.err (!%p2159_p8)
}
 0x500   : > { %s2163_s4 = scalar_lea.hbm %s2757_s20, 256  ;;  %s2167_s21 = scalar_lea.hbm %s2852_s8, 512 }
 0x501   : > { %p2164_p11 = scmp.ne.s32.totalorder %s2757_s20, %s2163_s4  ;;  %p2168_p1 = scmp.lt.u32.totalorder %s2757_s20, %s2852_s8 }
 0x502   : > { %p2169_p13 = scmp.lt.u32.totalorder %s2167_s21, %s2163_s4  ;;  %p2171_p7 = scmp.lt.u32.totalorder %s2163_s4, %s2757_s20 }
 0x503   : > { %p2165_p3 = pnand %p2164_p11, %p2893_p2 }
 0x504   : > { %p2170_p0 = por %p2169_p13, %p2168_p1 }
 0x505   : > { %p2166_p12 = pneg %p2165_p3 }
 0x506   : > { %p2172_p6 = por %p2171_p7, %p2170_p0 }
 0x508   : > { %p2173_p10 = pnand %p2172_p6, %p2166_p12 }
 0x50a   : > { %2176 = shalt.err (!%p2173_p10)
}
 0x50b   : > { %s2278_s26 = smov 128   ;;  %s2279_s29 = smov 8  }
 0x50c   : > { %1801 = dma.vmem_to_hbm [thread:$0]  (%p2893_p2), %s2749_s23, 256, %s2757_s20, %s1304_s9, %s2278_s26, %s2278_s26, %s2279_s29  }
 0x50d   : > { %s473_s0 = scalar_lea.vmem [#allocation15], %s1535_s5  ;;  %s2894_s20 = sld [smem:[#allocation31_spill]] }
 0x50e   : > { %s1338_s14 = sshll.u32 %s473_s0, 4  ;;  %s1309_s2 = scalar_lea.sflag [#allocation16], %s2621_s22  ;;  %s2790_s14 = int_to_ptr.vmem [resolvable:$true] %s1338_s14 }
 0x50f   : > { %s2177_s16 = scalar_lea.vmem %s2790_s14, 256  ;;  %s2280_s18 = smov [#allocation15]  }
 0x510   : > { %p2178_p5 = scmp.ne.s32.totalorder %s2790_s14, %s2177_s16  ;;  %s2181_s24 = sshll.u32 %s2280_s18, 4  ;;  %s2182_s24 = int_to_ptr.vmem [resolvable:$false] %s2181_s24 }
 0x511   : > { %s2183_s4 = scalar_lea.vmem %s2182_s24, 512  ;;  %p2184_p8 = scmp.lt.s32.totalorder %s2790_s14, %s2182_s24 }
 0x512   : > { %p2179_p9 = pnand %p2178_p5, %p2893_p2  ;;  %p2185_p11 = scmp.lt.s32.totalorder %s2183_s4, %s2177_s16 }
 0x513   : > { %s2797_s9 = scalar_lea.hbm %s2894_s20, %s1595_s19 }
 0x514   : > { %p2180_p4 = pneg %p2179_p9  ;;  %p2186_p3 = por %p2185_p11, %p2184_p8 }
 0x516   : > { %p2187_p12 = pnand %p2186_p3, %p2180_p4 }
 0x581   : > { %v1244_v19 = vpop.xlane.xlu0 %1243 }
 0x582   : > { %1945 = vrcp.f32 %v1244_v19 }
 0x585   : > { %v1247_v21 = vpop.xlane.xlu1 %1246 }
 0x586   : > { %1947 = vrcp.f32 %v1247_v21 }
 0x58c   : > { %v1946_v22 = vpop.eup %1945 }
 0x58d   : > { %v1295_v24 = vmul.f32 0.17677669, %v1946_v22 }
 0x590   : > { %v1948_v23 = vpop.eup %1947 }
 0x591   : > { %v1296_v28 = vmul.f32 0.17677669, %v1948_v23 }
 0x5cc   : > { %v1286_v25 = vpop.f32.mrb[20].mxu1 }
 0x5cd   : > { %v1297_v26 = vmul.f32 %v1295_v24, %v1286_v25  ;;  %v1775_v27 = vpop.f32.mrb[21].mxu1 }
 0x5ce   : > { %v1289_v29 = vpop.f32.mrb[22].mxu1 }
 0x5cf   : > { %v1299_v30 = vadd.f32 %v1297_v26, %v1068_v53  ;;  %v1298_v31 = vmul.f32 %v1296_v28, %v1289_v29  ;;  %v1776_v32 = vpop.f32.mrb[23].mxu1 }
 0x5d1   : > { %1301 = vst [vmem:[%s473_s0] sm:$0xff] %v1299_v30  ;;  %v1300_v33 = vadd.f32 %v1298_v31, %v1069_v16 }
 0x5d3   : > { %1302 = vst [vmem:[%s473_s0 + $0x8] sm:$0xff] %v1300_v33 }
 0x5d4   : > { %2190 = shalt.err (!%p2187_p12)
}
 0x5d5   : > { %s2191_s15 = scalar_lea.hbm %s2797_s9, 256  ;;  %s2195_s13 = scalar_lea.hbm %s2894_s20, 512 }
 0x5d6   : > { %p2192_p1 = scmp.ne.s32.totalorder %s2797_s9, %s2191_s15  ;;  %p2196_p7 = scmp.lt.u32.totalorder %s2797_s9, %s2894_s20 }
 0x5d7   : > { %p2197_p6 = scmp.lt.u32.totalorder %s2195_s13, %s2191_s15  ;;  %p2199_p5 = scmp.lt.u32.totalorder %s2191_s15, %s2797_s9 }
 0x5d8   : > { %p2193_p13 = pnand %p2192_p1, %p2893_p2 }
 0x5d9   : > { %p2198_p10 = por %p2197_p6, %p2196_p7 }
 0x5da   : > { %p2194_p0 = pneg %p2193_p13 }
 0x5db   : > { %p2200_p9 = por %p2199_p5, %p2198_p10 }
 0x5dd   : > { %p2201_p4 = pnand %p2200_p9, %p2194_p0 }
 0x5df   : > { %2204 = shalt.err (!%p2201_p4)
}
 0x5e0   : > { %1802 = dma.vmem_to_hbm [thread:$0]  (%p2893_p2), %s2790_s14, 256, %s2797_s9, %s1309_s2, %s2278_s26, %s2278_s26, %s2279_s29  }
 0x5e1 PF: > { %s1353_s3 = sand.u32 1, %s2251_s30   ;;  %p2895_p8 = scmp.ne.s32.totalorder %s2881_s28, 0 }
 0x5e2   : > { %p2896_p11 = scmp.ge.s32.totalorder %s2263_s12, 2  ;;  %s1354_s0 = scalar_lea.sflag [#allocation4], %s1353_s3 }
 0x5e4   : > { %p1829_p3 = pnand %p2896_p11, %p2895_p8 }
 0x5e6   : > { %2242 = dma.done.wait (!%p1829_p3), %s1354_s0, 256  }
 0x5e7   : > { %2244 = vsyncadd (!%p1829_p3), %s1354_s0, 4294967040  ;;  %s1363_s25 = scalar_lea.sflag [#allocation16], %s1353_s3 }
 0x5e8   : > { %2246 = dma.done.wait (!%p1829_p3), %s1363_s25, 256  }
 0x5e9   : > { %2248 = vsyncadd (!%p1829_p3), %s1363_s25, 4294967040  ;;  %s2897_s22 = sld [smem:[#allocation24_spill]]  ;;  %p31_p2 = scmp.ge.s32.totalorder %s2504_s27, 4  }
 0x5ea   : > { %s2898_s30 = smov %s2255_s10  ;;  %s2899_s10 = smov %s2259_s11 }
 0x5eb   : > { %s2901_s12 = smov %s2504_s27  ;;  %33 = sbr.rel (!%p31_p2) target bundleno = 19 (0x13), region = 147 }
 0x5ef   : > { %s2900_s11 = smov %s2897_s22 }
 0x5f2   :  { %1368 = vsyncpa [#allocation3], 1 }
 0x5f3   :  { %1370 = vsyncpa [#allocation3 + $0x1], 1 }
 0x5f4   :  { %1371 = vsyncpa [#allocation6], 1 }
 0x5f5   :  { %1373 = vsyncpa [#allocation6 + $0x1], 1 }
 0x5f6   :  { %1374 = vsyncpa [#allocation9], 1 }
 0x5f7   :  { %1375 = vsyncpa [#allocation12], 1 }
 0x5f8   :  { %1376 = vsyncpa [#allocation4], 1 }
 0x5f9   :  { %1378 = vsyncpa [#allocation4 + $0x1], 1 }
 0x5fa   :  { %1379 = vsyncpa [#allocation16], 1 }
 0x5fb   :  { %1381 = vsyncpa [#allocation16 + $0x1], 1 }

// kernel: tpu_custom_call.1
= control target key start
LH: loop header
LB: loop body
LE: loop exit
PB: predicated region body
PF: predicated region fallthrough
CT: control target
= control target key end

     0   :  { %s2844_s0 = inlined_call_operand.hbm [shape: bf16[2,16,128], index: 0, kind: input, shape index: {}]   ;;  %s2845_s1 = inlined_call_operand.hbm [shape: bf16[2,16,128], index: 1, kind: input, shape index: {}]   ;;  %s2846_s2 = inlined_call_operand.hbm [shape: bf16[128,128], index: 2, kind: input, shape index: {}]   ;;  %s2847_s3 = inlined_call_operand.hbm [shape: bf16[128,128], index: 3, kind: input, shape index: {}]   ;;  %s2848_s4 = inlined_call_operand.hbm [shape: bf16[128,128], index: 4, kind: input, shape index: {}]   ;;  %s2849_s5 = inlined_call_operand.hbm [shape: bf16[128,128], index: 5, kind: input, shape index: {}]   ;;  %s2850_s6 = inlined_call_operand.hbm [shape: bf16[128,128], index: 6, kind: input, shape index: {}]   ;;  %s2851_s7 = inlined_call_operand.vmem [shape: f32[4,128], index: 7, kind: input, shape index: {}]   ;;  %s2852_s8 = inlined_call_operand.hbm [shape: f32[2,16,128], index: 8, kind: output, shape index: {0}]   ;;  %s2853_s9 = inlined_call_operand.hbm [shape: f32[2,16,128], index: 9, kind: output, shape index: {1}]  }
   0x1   :  { %2862 = sst [smem:[#allocation25_spill]] %s2844_s0 }
   0x2   :  { %2863 = sst [smem:[#allocation26_spill]] %s2846_s2 }
   0x3   :  { %2864 = sst [smem:[#allocation27_spill]] %s2847_s3 }
   0x4   :  { %2865 = sst [smem:[#allocation28_spill]] %s2848_s4 }
   0x5   :  { %2866 = sst [smem:[#allocation29_spill]] %s2849_s5 }
   0x6   :  { %2867 = sst [smem:[#allocation30_spill]] %s2850_s6 }
   0x7   :  { %2868 = sst [smem:[#allocation31_spill]] %s2853_s9 }
   0x8   :  { %15 = vsyncpa [#allocation3], 0 }
   0x9   :  { %17 = vsyncpa [#allocation3 + $0x1], 0 }
   0xa   :  { %18 = vsyncpa [#allocation6], 0 }
   0xb   :  { %20 = vsyncpa [#allocation6 + $0x1], 0 }
   0xc   :  { %21 = vsyncpa [#allocation9], 0 }
   0xd   :  { %22 = vsyncpa [#allocation12], 0 }
   0xe   :  { %23 = vsyncpa [#allocation4], 0 }
   0xf   :  { %25 = vsyncpa [#allocation4 + $0x1], 0 }
  0x10   :  { %26 = vsyncpa [#allocation16], 0 }
  0x11   :  { %28 = vsyncpa [#allocation16 + $0x1], 0  ;;  %s2331_s30 = smov 0   ;;  %s2333_s10 = smov 0  }
  0x12   :  { %s2335_s11 = smov 0   ;;  %s2337_s12 = smov 0  }
  0x13 LB: > { %s2265_s13 = smov [#allocation7]   ;;  %s2352_s15 = sadd.s32 4294967295, %s2263_s12   ;;  %s2263_s12 = sphi %s2337_s12, %s2901_s12   ;;  %s2259_s11 = sphi %s2335_s11, %s2900_s11   ;;  %s2255_s10 = sphi %s2333_s10, %s2899_s10   ;;  %s2251_s30 = sphi %s2331_s30, %s2898_s30  }
  0x14   : > { %s281_s14 = sshll.u32 %s2265_s13, 4  ;;  %p1514_p0 = scmp.ge.s32.totalorder %s2263_s12, 1  ;;  %s2357_s14 = int_to_ptr.vmem [resolvable:$true] %s281_s14 }
  0x15   : > { %p2855_p1 = scmp.eq.s32.totalorder %s2352_s15, 0  ;;  %p269_p2 = scmp.lt.s32.totalorder %s2263_s12, 3 }
  0x16   : > { %s2266_s17 = smov [#allocation8]   ;;  %s2267_s20 = smov [#allocation11]  }
  0x17   : > { %p2359_p3 = pnand %p1514_p0, %p269_p2  ;;  %s294_s18 = sshll.u32 %s2266_s17, 4  ;;  %s2372_s18 = int_to_ptr.vmem [resolvable:$true] %s294_s18 }
  0x18   : > { %s320_s21 = sshll.u32 %s2267_s20, 4  ;;  %s2871_s2 = sld [smem:[#allocation26_spill]]  ;;  %s2374_s21 = int_to_ptr.vmem [resolvable:$true] %s320_s21 }
  0x19   : > { %s2869_s16 = scalar_select %p2359_p3, 1, 0 }
  0x1a   : > { %p1805_p5 = pneg %p2359_p3 }
  0x1c   : > { %p2368_p6 = pnand %p1805_p5, %p2855_p1 }
  0x1e   : > { %s1949_s24 = scalar_lea.hbm %s2871_s2, 1024  ;;  %p2384_p8 = pneg %p2368_p6 }
  0x1f   : > { %p1950_p7 = scmp.ne.s32.totalorder %s2871_s2, %s1949_s24  ;;  %p1956_p11 = scmp.lt.u32.totalorder %s1949_s24, %s2871_s2 }
  0x21   : > { %p1952_p9 = pnand %p2384_p8, %p1950_p7 }
  0x23   : > { %p1953_p10 = pneg %p1952_p9 }
  0x25   : > { %p1958_p12 = pnand %p1956_p11, %p1953_p10 }
  0x27   : > { %1961 = shalt.err (!%p1958_p12)
}
  0x28   : > { %s1962_s13 = scalar_lea.vmem %s2357_s14, 1024  ;;  %p1970_p5 = scmp.lt.s32.totalorder %s2357_s14, %s2357_s14 }
  0x29   : > { %p1963_p13 = scmp.ne.s32.totalorder %s2357_s14, %s1962_s13  ;;  %p1971_p4 = scmp.lt.s32.totalorder %s1962_s13, %s1962_s13 }
  0x2b   : > { %p1965_p0 = pnand %p1963_p13, %p2384_p8  ;;  %p1972_p7 = por %p1971_p4, %p1970_p5 }
  0x2d   : > { %p1966_p2 = pneg %p1965_p0 }
  0x2f   : > { %p1973_p9 = pnand %p1972_p7, %p1966_p2 }
  0x31   : > { %1976 = shalt.err (!%p1973_p9)
}
  0x32   : > { %s2857_s17 = smov 64   ;;  %s2859_s20 = smov 4  }
  0x33   : > { %1808 = dma.hbm_to_vmem [thread:$0]  (!%p2368_p6), %s2871_s2, 1024, %s2357_s14, [#allocation6], %s2857_s17, %s2857_s17, %s2859_s20  }
  0x34   : > { %s2873_s3 = sld [smem:[#allocation27_spill]] }
  0x3a   : > { %s1977_s26 = scalar_lea.hbm %s2873_s3, 1024 }
  0x3b   : > { %p1978_p4 = scmp.ne.s32.totalorder %s2873_s3, %s1977_s26  ;;  %p1984_p12 = scmp.lt.u32.totalorder %s1977_s26, %s2873_s3 }
  0x3d   : > { %p1980_p10 = pnand %p1978_p4, %p2384_p8 }
  0x3f   : > { %p1981_p11 = pneg %p1980_p10 }
  0x41   : > { %p1986_p13 = pnand %p1984_p12, %p1981_p11 }
  0x43   : > { %1989 = shalt.err (!%p1986_p13)
}
  0x44   : > { %s1990_s14 = scalar_lea.vmem %s2372_s18, 1024  ;;  %p1998_p7 = scmp.lt.s32.totalorder %s2372_s18, %s2372_s18 }
  0x45   : > { %p1991_p0 = scmp.ne.s32.totalorder %s2372_s18, %s1990_s14  ;;  %p1999_p9 = scmp.lt.s32.totalorder %s1990_s14, %s1990_s14 }
  0x47   : > { %p1993_p2 = pnand %p1991_p0, %p2384_p8  ;;  %p2000_p4 = por %p1999_p9, %p1998_p7 }
  0x49   : > { %p1994_p5 = pneg %p1993_p2 }
  0x4b   : > { %p2001_p10 = pnand %p2000_p4, %p1994_p5 }
  0x4d   : > { %2004 = shalt.err (!%p2001_p10)
}
  0x4e   : > { %1811 = dma.hbm_to_vmem [thread:$0]  (!%p2368_p6), %s2873_s3, 1024, %s2372_s18, [#allocation9], %s2857_s17, %s2857_s17, %s2859_s20  }
  0x4f   : > { %s2874_s5 = sld [smem:[#allocation29_spill]] }
  0x55   : > { %s2005_s25 = scalar_lea.hbm %s2874_s5, 1024 }
  0x56   : > { %p2006_p11 = scmp.ne.s32.totalorder %s2874_s5, %s2005_s25  ;;  %p2012_p0 = scmp.lt.u32.totalorder %s2005_s25, %s2874_s5 }
  0x58   : > { %p2008_p12 = pnand %p2006_p11, %p2384_p8 }
  0x5a   : > { %p2009_p13 = pneg %p2008_p12 }
  0x5c   : > { %p2014_p2 = pnand %p2012_p0, %p2009_p13 }
  0x5e   : > { %2017 = shalt.err (!%p2014_p2)
}
  0x5f   : > { %s2018_s18 = scalar_lea.vmem %s2374_s21, 1024  ;;  %p2026_p4 = scmp.lt.s32.totalorder %s2374_s21, %s2374_s21 }
  0x60   : > { %p2019_p5 = scmp.ne.s32.totalorder %s2374_s21, %s2018_s18  ;;  %p2027_p10 = scmp.lt.s32.totalorder %s2018_s18, %s2018_s18 }
  0x62   : > { %p2021_p7 = pnand %p2019_p5, %p2384_p8  ;;  %p2028_p11 = por %p2027_p10, %p2026_p4 }
  0x64   : > { %p2022_p9 = pneg %p2021_p7 }
  0x66   : > { %p2029_p12 = pnand %p2028_p11, %p2022_p9 }
  0x68   : > { %2032 = shalt.err (!%p2029_p12)
}
  0x69   : > { %1817 = dma.hbm_to_vmem [thread:$0]  (!%p2368_p6), %s2874_s5, 1024, %s2374_s21, [#allocation12], %s2857_s17, %s2857_s17, %s2859_s20  }
  0x6a   : > { %s2270_s22 = smov [#allocation10]   ;;  %s2271_s24 = smov [#allocation13]  }
  0x6b   : > { %s307_s23 = sshll.u32 %s2270_s22, 4  ;;  %s333_s25 = sshll.u32 %s2271_s24, 4  ;;  %s308_s23 = int_to_ptr.vmem [resolvable:$true] %s307_s23  ;;  %s334_s25 = int_to_ptr.vmem [resolvable:$true] %s333_s25 }
  0x6c   : > { %s2875_s4 = sld [smem:[#allocation28_spill]] }
  0x72   : > { %s2033_s29 = scalar_lea.hbm %s2875_s4, 1024 }
  0x73   : > { %p2034_p13 = scmp.ne.s32.totalorder %s2875_s4, %s2033_s29  ;;  %p2040_p5 = scmp.lt.u32.totalorder %s2033_s29, %s2875_s4 }
  0x75   : > { %p2036_p0 = pnand %p2034_p13, %p2384_p8 }
  0x77   : > { %p2037_p2 = pneg %p2036_p0 }
  0x79   : > { %p2042_p7 = pnand %p2040_p5, %p2037_p2 }
  0x7b   : > { %2045 = shalt.err (!%p2042_p7)
}
  0x7c   : > { %s2046_s21 = scalar_lea.vmem %s308_s23, 1024  ;;  %p2054_p11 = scmp.lt.s32.totalorder %s308_s23, %s308_s23 }
  0x7d   : > { %p2047_p9 = scmp.ne.s32.totalorder %s308_s23, %s2046_s21  ;;  %p2055_p12 = scmp.lt.s32.totalorder %s2046_s21, %s2046_s21 }
  0x7f   : > { %p2049_p4 = pnand %p2047_p9, %p2384_p8  ;;  %p2056_p1 = por %p2055_p12, %p2054_p11 }
  0x81   : > { %p2050_p10 = pneg %p2049_p4 }
  0x83   : > { %p2057_p3 = pnand %p2056_p1, %p2050_p10 }
  0x85   : > { %2060 = shalt.err (!%p2057_p3)
}
  0x86   : > { %1814 = dma.hbm_to_vmem [thread:$0]  (!%p2368_p6), %s2875_s4, 1024, %s308_s23, [#allocation9], %s2857_s17, %s2857_s17, %s2859_s20  }
  0x87   : > { %s2876_s6 = sld [smem:[#allocation30_spill]] }
  0x8d   : > { %s2061_s26 = scalar_lea.hbm %s2876_s6, 1024 }
  0x8e   : > { %p2062_p1 = scmp.ne.s32.totalorder %s2876_s6, %s2061_s26  ;;  %p2068_p0 = scmp.lt.u32.totalorder %s2061_s26, %s2876_s6 }
  0x90   : > { %p2064_p3 = pnand %p2062_p1, %p2384_p8 }
  0x92   : > { %p2065_p13 = pneg %p2064_p3 }
  0x94   : > { %p2070_p2 = pnand %p2068_p0, %p2065_p13 }
  0x96   : > { %2073 = shalt.err (!%p2070_p2)
}
  0x97   : > { %s2074_s14 = scalar_lea.vmem %s334_s25, 1024  ;;  %p2082_p4 = scmp.lt.s32.totalorder %s334_s25, %s334_s25 }
  0x98   : > { %p2075_p5 = scmp.ne.s32.totalorder %s334_s25, %s2074_s14  ;;  %p2083_p10 = scmp.lt.s32.totalorder %s2074_s14, %s2074_s14 }
  0x9a   : > { %p2077_p7 = pnand %p2075_p5, %p2384_p8  ;;  %p2084_p11 = por %p2083_p10, %p2082_p4 }
  0x9c   : > { %p2078_p9 = pneg %p2077_p7 }
  0x9e   : > { %p2085_p12 = pnand %p2084_p11, %p2078_p9 }
  0xa0   : > { %2088 = shalt.err (!%p2085_p12)
}
  0xa1   : > { %1820 = dma.hbm_to_vmem [thread:$0]  (!%p2368_p6), %s2876_s6, 1024, %s334_s25, [#allocation12], %s2857_s17, %s2857_s17, %s2859_s20  }
  0xa2   : > { %s1513_s19 = sadd.s32 4294967294, %s2263_s12   ;;  %s2504_s27 = sadd.s32 1, %s2263_s12  }
  0xa3   : > { %s41_s2 = sadd.s32 1, %s2259_s11  ;;  %s38_s9 = ssub.s32 %s2263_s12, %s2504_s27 }
  0xa4   : > { %p48_p8 = scmp.ne.s32.totalorder %s2259_s11, %s2255_s10  ;;  %p39_p1 = scmp.eq.s32.totalorder %s38_s9, 0 }
  0xa5   : > { %p49_p3 = scmp.eq.s32.totalorder %s2263_s12, 0  ;;  %p54_p13 = scmp.ne.s32.totalorder %s2255_s10, %s2251_s30 }
  0xa6   : > { %p230_p0 = scmp.eq.s32.totalorder %s2352_s15, 1  ;;  %p2878_p5 = scmp.eq.s32.totalorder %s2352_s15, 0 }
  0xa7   : > { %s2516_s22 = scalar_select %p39_p1, %s2259_s11, %s41_s2  }
  0xa8   : > { %p50_p2 = por %p49_p3, %p48_p8  ;;  %p2520_p7 = por %p2878_p5, %p54_p13 }
  0xa9   : > { %2877 = sst [smem:[#allocation24_spill]] %s2516_s22  ;;  %p2524_p6 = por %p230_p0, %p48_p8 }
  0xaa   : > { %p236_p9 = scmp.eq.s32.totalorder %s1513_s19, 1  ;;  %p1840_p4 = scmp.lt.s32.totalorder %s2263_s12, 2 }
  0xab   : > { %s2880_s25 = scalar_select %p2524_p6, 1, 0 }
  0xac   : > { %s350_s26 = sand.u32 1, %s2259_s11   ;;  %p2530_p10 = por %p236_p9, %p54_p13 }
  0xad   : > { %s2534_s29 = sshll.u32 %s350_s26, 3  ;;  %s1593_s13 = sshll.u32 %s2263_s12, 7 }
  0xae   : > { %s2881_s28 = scalar_select %p2530_p10, 1, 0 }
  0xaf   : > { %s2882_s0 = sld [smem:[#allocation25_spill]]  ;;  %s354_s21 = scalar_lea.vmem [#allocation2], %s2534_s29 }
  0xb0   : > { %s361_s19 = sshll.u32 %s354_s21, 4  ;;  %p2543_p11 = pnand %p1840_p4, %p50_p2  ;;  %s2547_s19 = int_to_ptr.vmem [resolvable:$true] %s361_s19 }
  0xb1   : > { %s2552_s18 = scalar_lea.hbm %s2845_s1, %s1593_s13  ;;  %s2554_s14 = scalar_lea.sflag [#allocation3], %s350_s26 }
  0xb2   : > { %p2091_p8 = pneg %p2543_p11 }
  0xb5   : > { %s2540_s23 = scalar_lea.hbm %s2882_s0, %s1593_s13  ;;  %s2094_s4 = scalar_lea.hbm %s2882_s0, 256 }
  0xb6   : > { %s2089_s20 = scalar_lea.hbm %s2540_s23, 128  ;;  %p2095_p13 = scmp.lt.u32.totalorder %s2540_s23, %s2882_s0 }
  0xb7   : > { %p2090_p12 = scmp.ne.s32.totalorder %s2540_s23, %s2089_s20  ;;  %p2096_p0 = scmp.lt.u32.totalorder %s2094_s4, %s2089_s20 }
  0xb8   : > { %p2098_p5 = scmp.lt.u32.totalorder %s2089_s20, %s2540_s23 }
  0xb9   : > { %p2092_p1 = pnand %p2091_p8, %p2090_p12  ;;  %p2097_p2 = por %p2096_p0, %p2095_p13 }
  0xbb   : > { %p2093_p3 = pneg %p2092_p1  ;;  %p2099_p9 = por %p2098_p5, %p2097_p2 }
  0xbd   : > { %p2100_p4 = pnand %p2099_p9, %p2093_p3 }
  0xbf   : > { %2103 = shalt.err (!%p2100_p4)
}
  0xc0   : > { %s2104_s17 = scalar_lea.vmem %s2547_s19, 128  ;;  %s2272_s3 = smov [#allocation2]  }
  0xc1   : > { %p2105_p12 = scmp.ne.s32.totalorder %s2547_s19, %s2104_s17  ;;  %s2109_s26 = sshll.u32 %s2272_s3, 4  ;;  %s2110_s26 = int_to_ptr.vmem [resolvable:$false] %s2109_s26 }
  0xc2   : > { %s2111_s5 = scalar_lea.vmem %s2110_s26, 256  ;;  %p2112_p6 = scmp.lt.s32.totalorder %s2547_s19, %s2110_s26 }
  0xc3   : > { %p2107_p1 = pnand %p2105_p12, %p2091_p8  ;;  %p2113_p13 = scmp.lt.s32.totalorder %s2111_s5, %s2104_s17 }
  0xc5   : > { %p2108_p10 = pneg %p2107_p1  ;;  %p2114_p0 = por %p2113_p13, %p2112_p6 }
  0xc7   : > { %p2115_p2 = pnand %p2114_p0, %p2108_p10 }
  0xc9   : > { %2118 = shalt.err (!%p2115_p2)
}
  0xca   : > { %s2884_s4 = smov 4   ;;  %s2885_s6 = smov 64  }
  0xcb   : > { %1824 = dma.hbm_to_vmem [thread:$0]  (!%p2543_p11), %s2540_s23, 128, %s2547_s19, %s2554_s14, %s2885_s6, %s2885_s6, %s2884_s4  }
  0xcc   : > { %s375_s20 = scalar_lea.vmem [#allocation5], %s2534_s29  ;;  %s371_s9 = sand.u32 1, %s2263_s12  }
  0xcd   : > { %s382_s13 = sshll.u32 %s375_s20, 4  ;;  %s2589_s21 = scalar_lea.sflag [#allocation6], %s371_s9  ;;  %s2587_s13 = int_to_ptr.vmem [resolvable:$true] %s382_s13 }
  0xce   : > { %s2119_s17 = scalar_lea.hbm %s2552_s18, 128  ;;  %s2124_s5 = scalar_lea.hbm %s2845_s1, 256 }
  0xcf   : > { %p2120_p6 = scmp.ne.s32.totalorder %s2552_s18, %s2119_s17  ;;  %p2125_p5 = scmp.lt.u32.totalorder %s2552_s18, %s2845_s1 }
  0xd0   : > { %p2126_p9 = scmp.lt.u32.totalorder %s2124_s5, %s2119_s17  ;;  %p2128_p12 = scmp.lt.u32.totalorder %s2119_s17, %s2552_s18 }
  0xd1   : > { %p2122_p10 = pnand %p2120_p6, %p2091_p8 }
  0xd2   : > { %p2127_p4 = por %p2126_p9, %p2125_p5 }
  0xd3   : > { %p2123_p3 = pneg %p2122_p10 }
  0xd4   : > { %p2129_p1 = por %p2128_p12, %p2127_p4 }
  0xd6   : > { %p2130_p13 = pnand %p2129_p1, %p2123_p3 }
  0xd8   : > { %2133 = shalt.err (!%p2130_p13)
}
  0xd9   : > { %s2134_s29 = scalar_lea.vmem %s2587_s13, 128  ;;  %s2273_s23 = smov [#allocation5]  }
  0xda   : > { %p2135_p0 = scmp.ne.s32.totalorder %s2587_s13, %s2134_s29  ;;  %s2139_s19 = sshll.u32 %s2273_s23, 4  ;;  %s2140_s19 = int_to_ptr.vmem [resolvable:$false] %s2139_s19 }
  0xdb   : > { %s2141_s0 = scalar_lea.vmem %s2140_s19, 256  ;;  %p2142_p10 = scmp.lt.s32.totalorder %s2587_s13, %s2140_s19 }
  0xdc   : > { %p2137_p2 = pnand %p2135_p0, %p2091_p8  ;;  %p2143_p5 = scmp.lt.s32.totalorder %s2141_s0, %s2134_s29 }
  0xde   : > { %p2138_p6 = pneg %p2137_p2  ;;  %p2144_p9 = por %p2143_p5, %p2142_p10 }
  0xe0   : > { %p2145_p4 = pnand %p2144_p9, %p2138_p6 }
  0xe2   : > { %2148 = shalt.err (!%p2145_p4)
}
  0xe3   : > { %1827 = dma.hbm_to_vmem [thread:$0]  (!%p2543_p11), %s2552_s18, 128, %s2587_s13, %s2589_s21, %s2885_s6, %s2885_s6, %s2884_s4  }
  0xe4   : > { %p2886_p8 = scmp.ne.s32.totalorder %s2869_s16, 0 }
  0xe5   : > { %s2621_s22 = sand.u32 (!%p2886_p8), 1, %s2255_s10  }
  0xe6   : > { %394 = sbr.rel (%p2886_p8) target bundleno = 1505 (0x5e1), region = 52  ;;  %s1528_s14 = sshll.u32 (!%p2886_p8), %s2621_s22, 3 }
  0xe7   : > { %s397_s20 = scalar_lea.sflag (!%p2886_p8), [#allocation3], %s2621_s22  ;;  %s2625_s9 = scalar_lea.vmem (!%p2886_p8), [#allocation2], %s1528_s14 }
  0xed   : > { %2222 = dma.done.wait (%p2520_p7), %s397_s20, 128  }
  0xee   : > { %2224 = vsyncadd (%p2520_p7), %s397_s20, 4294967168  ;;  %s405_s2 = sand.u32 1, %s2352_s15   ;;  %s2632_s18 = scalar_lea.vmem [#allocation5], %s1528_s14 }
  0xef   : > { %s406_s16 = scalar_lea.sflag [#allocation6], %s405_s2 }
  0xf0   : > { %2226 = dma.done.wait (%p2520_p7), %s406_s16, 128  }
  0xf1   : > { %2228 = vsyncadd (%p2520_p7), %s406_s16, 4294967168  ;;  %p2887_p11 = scmp.eq.s32.totalorder %s2352_s15, 0 }
  0xf3   : > { %2230 = dma.done.wait (%p2887_p11), [#allocation6], 1024   ;;  %p2888_p3 = pmov %p2887_p11 }
  0xf5   : > { %2232 = vsyncadd (%p2888_p3), [#allocation6], 4294966272  ;;  %p2889_p12 = pmov %p2888_p3 }
  0xf6   : > { %p2890_p1 = pmov %p2888_p3 }
  0xf7   : > { %2234 = dma.done.wait (%p2889_p12), [#allocation9], 2048  }
  0xf8   : > { %2236 = vsyncadd (%p2890_p1), [#allocation9], 4294965248  ;;  %p2891_p13 = pmov %p2890_p1 }
  0xf9   : > { %p2892_p0 = pmov %p2890_p1 }
  0xfa   : > { %2238 = dma.done.wait (%p2891_p13), [#allocation12], 2048  }
  0xfb   : > { %2240 = vsyncadd (%p2892_p0), [#allocation12], 4294965248  ;;  %v1891_v0 = vld [vmem:[#allocation8] sm:$0xff]   ;;  %v1893_v2 = vld [vmem:[#allocation8 + $0x8] sm:$0xff]   ;;  %v2274_v20 = vmov 0.0   ;;  %vm2275_vm0 = vmmov 0  }
  0xfc   : > { %v1892_v1 = vld [vmem:[#allocation7] sm:$0xff]   ;;  %1673 = vmatprep.subr.bf16.mxu1 %v1891_v0  ;;  %v1894_v3 = vld [vmem:[#allocation7 + $0x8] sm:$0xff]   ;;  %v1895_v4 = vld [vmem:[#allocation8 + $0x10] sm:$0xff]   ;;  %vm1115_vm2 = vcmask 130048   ;;  %s1535_s5 = sshll.u32 %s2621_s22, 4  ;;  %s1595_s19 = sshll.u32 %s2352_s15, 8 }
  0xfd   : > { %1674 = vmatpush3.bf16.msra.mxu1 %v1891_v0  ;;  %1653 = vmatprep.subr.bf16.mxu0 %v1892_v1  ;;  %v1896_v5 = vld [vmem:[#allocation7 + $0x10] sm:$0xff]   ;;  %v1897_v6 = vld [vmem:[#allocation8 + $0x18] sm:$0xff]   ;;  %v1899_v8 = vld [vmem:[#allocation8 + $0x20] sm:$0xff]   ;;  %s2737_s29 = scalar_lea.vmem [#allocation14], %s1535_s5  ;;  %s2757_s20 = scalar_lea.hbm %s2852_s8, %s1595_s19 }
  0xfe   : > { %1675 = vmatprep.subr.bf16.mxu1 %v1893_v2  ;;  %1654 = vmatpush3.bf16.msra.mxu0 %v1892_v1  ;;  %v1898_v7 = vld [vmem:[#allocation7 + $0x18] sm:$0xff]   ;;  %v1900_v9 = vld [vmem:[#allocation7 + $0x20] sm:$0xff]   ;;  %v1901_v11 = vld [vmem:[#allocation8 + $0x28] sm:$0xff]   ;;  %s1322_s23 = sshll.u32 %s2737_s29, 4  ;;  %p2893_p2 = scmp.ne.s32.totalorder %s2880_s25, 0  ;;  %s2749_s23 = int_to_ptr.vmem [resolvable:$true] %s1322_s23 }
  0xff   : > { %1655 = vmatprep.subr.bf16.mxu0 %v1894_v3  ;;  %v2651_v10 = vld [vmem:[%s2625_s9] sm:$0xff]   ;;  %v1903_v13 = vld [vmem:[#allocation8 + $0x30] sm:$0xff]   ;;  %v1905_v15 = vld [vmem:[#allocation8 + $0x38] sm:$0xff]   ;;  %s1304_s9 = scalar_lea.sflag [#allocation4], %s2621_s22  ;;  %s2149_s2 = scalar_lea.vmem %s2749_s23, 256 }
 0x100   : > { %v1902_v12 = vld [vmem:[#allocation7 + $0x28] sm:$0xff]   ;;  %1689 = vmatprep.mubr.bf16.mxu1 %v2651_v10  ;;  %1669 = vmatprep.mubr.bf16.mxu0 %v2651_v10  ;;  %v1904_v14 = vld [vmem:[#allocation7 + $0x30] sm:$0xff]   ;;  %v1907_v16 = vld [vmem:[#allocation7 + $0x38] sm:$0xff]   ;;  %p2150_p7 = scmp.ne.s32.totalorder %s2749_s23, %s2149_s2  ;;  %s2277_s16 = smov [#allocation14]  }
 0x101   : > { %1676 = vmatpush3.bf16.msra.mxu1 %v1893_v2  ;;  %v1909_v17 = vld [vmem:[#allocation10] sm:$0xff]   ;;  %v2656_v18 = vld [vmem:[%s2632_s18] sm:$0xff]   ;;  %v1910_v21 = vld [vmem:[#allocation10 + $0x8] sm:$0xff]   ;;  %s2153_s18 = sshll.u32 %s2277_s16, 4  ;;  %s2154_s18 = int_to_ptr.vmem [resolvable:$false] %s2153_s18 }
 0x102   : > { %1677 = vmatprep.subr.bf16.mxu1 %v1895_v4  ;;  %1656 = vmatpush3.bf16.msra.mxu0 %v1894_v3  ;;  %v1917_v19 = vld [vmem:[#allocation13] sm:$0xff]   ;;  %v1918_v22 = vld [vmem:[#allocation13 + $0x8] sm:$0xff]   ;;  %v1911_v23 = vld [vmem:[#allocation10 + $0x10] sm:$0xff]   ;;  %p2151_p6 = pnand %p2150_p7, %p2893_p2  ;;  %s2155_s24 = scalar_lea.vmem %s2154_s18, 512 }
 0x103   : > { %1657 = vmatprep.subr.bf16.mxu0 %v1896_v5  ;;  %v1920_v24 = vld [vmem:[#allocation13 + $0x10] sm:$0xff]   ;;  %v1912_v25 = vld [vmem:[#allocation10 + $0x18] sm:$0xff]   ;;  %v1913_v27 = vld [vmem:[#allocation10 + $0x20] sm:$0xff]   ;;  %p2156_p5 = scmp.lt.s32.totalorder %s2749_s23, %s2154_s18  ;;  %p2157_p9 = scmp.lt.s32.totalorder %s2155_s24, %s2149_s2 }
 0x104   : > { %v1922_v26 = vld [vmem:[#allocation13 + $0x18] sm:$0xff]   ;;  %v1924_v28 = vld [vmem:[#allocation13 + $0x20] sm:$0xff]   ;;  %v1914_v29 = vld [vmem:[#allocation10 + $0x28] sm:$0xff]   ;;  %p2152_p10 = pneg %p2151_p6 }
 0x105   : > { %1678 = vmatpush3.bf16.msra.mxu1 %v1895_v4  ;;  %v1926_v30 = vld [vmem:[#allocation13 + $0x28] sm:$0xff]   ;;  %v1915_v31 = vld [vmem:[#allocation10 + $0x30] sm:$0xff]   ;;  %v1916_v33 = vld [vmem:[#allocation10 + $0x38] sm:$0xff]   ;;  %p2158_p4 = por %p2157_p9, %p2156_p5 }
 0x106   : > { %1679 = vmatprep.subr.bf16.mxu1 %v1897_v6  ;;  %1658 = vmatpush3.bf16.msra.mxu0 %v1896_v5  ;;  %v1928_v32 = vld [vmem:[#allocation13 + $0x30] sm:$0xff]   ;;  %v1930_v34 = vld [vmem:[#allocation13 + $0x38] sm:$0xff]   ;;  %v1919_v35 = vld [vmem:[#allocation11] sm:$0xff]  }
 0x107   : > { %1659 = vmatprep.subr.bf16.mxu0 %v1898_v7  ;;  %v1921_v36 = vld [vmem:[#allocation11 + $0x8] sm:$0xff]   ;;  %v1923_v37 = vld [vmem:[#allocation11 + $0x10] sm:$0xff]   ;;  %v1925_v38 = vld [vmem:[#allocation11 + $0x18] sm:$0xff]   ;;  %p2159_p8 = pnand %p2158_p4, %p2152_p10 }
 0x108   : > { %v1927_v39 = vld [vmem:[#allocation11 + $0x20] sm:$0xff]   ;;  %v1929_v40 = vld [vmem:[#allocation11 + $0x28] sm:$0xff]   ;;  %v1931_v41 = vld [vmem:[#allocation11 + $0x30] sm:$0xff]  }
 0x109   : > { %1680 = vmatpush3.bf16.msra.mxu1 %v1897_v6  ;;  %v1932_v42 = vld [vmem:[#allocation11 + $0x38] sm:$0xff]   ;;  %v1548_v43 = vld [vmem:[%s2851_s7 + $0x1] ss:$0 sm:$0xff]  ;;  %v1539_v44 = vld [vmem:[%s2851_s7] ss:$0 sm:$0xff] }
 0x10a   : > { %1681 = vmatprep.subr.bf16.mxu1 %v1899_v8  ;;  %1660 = vmatpush3.bf16.msra.mxu0 %v1898_v7  ;;  %v1557_v1 = vld [vmem:[%s2851_s7 + $0x2] ss:$0 sm:$0xff] }
 0x10b   : > { %1661 = vmatprep.subr.bf16.mxu0 %v1900_v9 }
 0x10d   : > { %1682 = vmatpush3.bf16.msra.mxu1 %v1899_v8 }
 0x10e   : > { %1683 = vmatprep.subr.bf16.mxu1 %v1901_v11  ;;  %1662 = vmatpush3.bf16.msra.mxu0 %v1900_v9 }
 0x10f   : > { %1663 = vmatprep.subr.bf16.mxu0 %v1902_v12 }
 0x111   : > { %1684 = vmatpush3.bf16.msra.mxu1 %v1901_v11 }
 0x112   : > { %1685 = vmatprep.subr.bf16.mxu1 %v1903_v13  ;;  %1664 = vmatpush3.bf16.msra.mxu0 %v1902_v12 }
 0x113   : > { %1665 = vmatprep.subr.bf16.mxu0 %v1904_v14 }
 0x115   : > { %1686 = vmatpush3.bf16.msra.mxu1 %v1903_v13 }
 0x116   : > { %1687 = vmatprep.subr.bf16.mxu1 %v1905_v15  ;;  %1666 = vmatpush3.bf16.msra.mxu0 %v1904_v14 }
 0x117   : > { %1667 = vmatprep.subr.bf16.mxu0 %v1907_v16 }
 0x119   : > { %1688 = vmatpush3.bf16.msra.mxu1 %v1905_v15 }
 0x11a   : > { %1668 = vmatpush3.bf16.msra.mxu0 %v1907_v16  ;;  %1713 = vmatprep.subr.bf16.mxu1 %v2274_v20 }
 0x11b   : > { %1693 = vmatprep.subr.bf16.mxu0 %v1909_v17 }
 0x11c   : > { %1690 = vmatmul.mubr.bf16.vlgmr.msra.gmra.mrb[0].mxu1 %v2656_v18 }
 0x11d   : > { %1670 = vmatmul.mubr.bf16.vlgmr.msra.gmra.mrb[0].mxu0 %v2656_v18  ;;  %1714 = vmatpush3.bf16.msra.mxu1 %v1917_v19 }
 0x11e   : > { %1694 = vmatpush3.bf16.msra.mxu0 %v1909_v17  ;;  %1709 = vmatprep.mubr.bf16.mxu0 %v2651_v10 }
 0x11f   : > { %1695 = vmatprep.subr.bf16.mxu0 %v1910_v21  ;;  %1715 = vmatprep.subr.bf16.mxu1 %v2274_v20 }
 0x120   : > { %1729 = vmatprep.mubr.msk.bf16.mxu1 %vm2275_vm0, %v2274_v20 }
 0x121   : > { %1716 = vmatpush3.bf16.msra.mxu1 %v1918_v22 }
 0x122   : > { %1696 = vmatpush3.bf16.msra.mxu0 %v1910_v21  ;;  %1717 = vmatprep.subr.bf16.mxu1 %v2274_v20 }
 0x123   : > { %1697 = vmatprep.subr.bf16.mxu0 %v1911_v23 }
 0x125   : > { %1718 = vmatpush3.bf16.msra.mxu1 %v1920_v24 }
 0x126   : > { %1698 = vmatpush3.bf16.msra.mxu0 %v1911_v23  ;;  %1719 = vmatprep.subr.bf16.mxu1 %v2274_v20 }
 0x127   : > { %1699 = vmatprep.subr.bf16.mxu0 %v1912_v25 }
 0x129   : > { %1720 = vmatpush3.bf16.msra.mxu1 %v1922_v26 }
 0x12a   : > { %1700 = vmatpush3.bf16.msra.mxu0 %v1912_v25  ;;  %1721 = vmatprep.subr.bf16.mxu1 %v2274_v20  ;;  %v1070_v25 = vlaneseq }
 0x12b   : > { %1701 = vmatprep.subr.bf16.mxu0 %v1913_v27 }
 0x12c   : > { %v1071_v26 = vand.u32 127, %v1070_v25 }
 0x12d   : > { %1722 = vmatpush3.bf16.msra.mxu1 %v1924_v28 }
 0x12e   : > { %1702 = vmatpush3.bf16.msra.mxu0 %v1913_v27  ;;  %1723 = vmatprep.subr.bf16.mxu1 %v2274_v20  ;;  %vm1072_vm1 = vcmp.lt.s32.totalorder %v1071_v26, 8  ;;  %v2276_v27 = vmov -1e+30  }
 0x12f   : > { %1703 = vmatprep.subr.bf16.mxu0 %v1914_v29  ;;  %v1073_v28 = vsel %vm1072_vm1, 0.0, %v2276_v27 }
 0x131   : > { %1724 = vmatpush3.bf16.msra.mxu1 %v1926_v30 }
 0x132   : > { %1704 = vmatpush3.bf16.msra.mxu0 %v1914_v29  ;;  %1725 = vmatprep.subr.bf16.mxu1 %v2274_v20 }
 0x133   : > { %1705 = vmatprep.subr.bf16.mxu0 %v1915_v31 }
 0x135   : > { %1726 = vmatpush3.bf16.msra.mxu1 %v1928_v32 }
 0x136   : > { %1706 = vmatpush3.bf16.msra.mxu0 %v1915_v31  ;;  %1727 = vmatprep.subr.bf16.mxu1 %v2274_v20 }
 0x137   : > { %1707 = vmatprep.subr.bf16.mxu0 %v1916_v33 }
 0x139   : > { %1728 = vmatpush3.bf16.msra.mxu1 %v1930_v34 }
 0x13a   : > { %1708 = vmatpush3.bf16.msra.mxu0 %v1916_v33  ;;  %1753 = vmatprep.subr.bf16.mxu1 %v2274_v20 }
 0x13b   : > { %1733 = vmatprep.subr.bf16.mxu0 %v2274_v20 }
 0x13c   : > { %1730 = vmatmul.mubr.bf16.vlgmr.msra.gmra.mrb[4].mxu1 %v2656_v18 }
 0x13d   : > { %1710 = vmatmul.mubr.bf16.vlgmr.msra.gmra.mrb[4].mxu0 %v2656_v18  ;;  %1755 = vmatprep.mubr.msk.bf16.mxu1 %vm2275_vm0, %v2274_v20  ;;  %v1582_v18 = vld [vmem:[%s2851_s7 + $0x3] ss:$0 sm:$0xff] }
 0x13e   : > { %1734 = vmatpush3.bf16.msra.mxu0 %v1919_v35  ;;  %1749 = vmatprep.mubr.msk.bf16.mxu0 %vm2275_vm0, %v2274_v20 }
 0x13f   : > { %1735 = vmatprep.subr.bf16.mxu0 %v2274_v20 }
 0x142   : > { %1736 = vmatpush3.bf16.msra.mxu0 %v1921_v36 }
 0x143   : > { %1737 = vmatprep.subr.bf16.mxu0 %v2274_v20 }
 0x146   : > { %1738 = vmatpush3.bf16.msra.mxu0 %v1923_v37 }
 0x147   : > { %1739 = vmatprep.subr.bf16.mxu0 %v2274_v20 }
 0x14a   : > { %1740 = vmatpush3.bf16.msra.mxu0 %v1925_v38 }
 0x14b   : > { %1741 = vmatprep.subr.bf16.mxu0 %v2274_v20 }
 0x14e   : > { %1742 = vmatpush3.bf16.msra.mxu0 %v1927_v39 }
 0x14f   : > { %1743 = vmatprep.subr.bf16.mxu0 %v2274_v20 }
 0x152   : > { %1744 = vmatpush3.bf16.msra.mxu0 %v1929_v40 }
 0x153   : > { %1745 = vmatprep.subr.bf16.mxu0 %v2274_v20 }
 0x156   : > { %1746 = vmatpush3.bf16.msra.mxu0 %v1931_v41 }
 0x157   : > { %1747 = vmatprep.subr.bf16.mxu0 %v2274_v20 }
 0x15a   : > { %1748 = vmatpush3.bf16.msra.mxu0 %v1932_v42 }
 0x15d   : > { %1750 = vmatmul.mubr.bf16.vlgmr.msra.gmra.mrb[8].mxu0 %v2651_v10 }
 0x1ef   : > { %v1691_v45 = vpop.f32.mrb[0].mxu1 }
 0x1f0   : > { %v716_v46 = vpop.f32.mrb[1].mxu1  ;;  %v1671_v47 = vpop.f32.mrb[0].mxu0  ;;  %v725_v52 = vadd.f32 %v1691_v45, %v1548_v43 }
 0x1f1   : > { %v2693_v48 = vadd.f32 %v1548_v43, %v716_v46  ;;  %v1692_v49 = vpop.f32.mrb[2].mxu1  ;;  %v2695_v50 = vadd.f32 %v1671_v47, %v1539_v44  ;;  %v597_v51 = vpop.f32.mrb[1].mxu0 }
 0x1f2   : > { %v728_v53 = vadd.f32 %v1692_v49, %v1548_v43  ;;  %v719_v54 = vpop.f32.mrb[3].mxu1  ;;  %v598_v55 = vadd.f32 %v1539_v44, %v597_v51  ;;  %v1672_v56 = vpop.f32.mrb[2].mxu0 }
 0x1f3   : > { %v2697_v57 = vadd.f32 %v1548_v43, %v719_v54  ;;  %v2699_v58 = vadd.f32 %v1672_v56, %v1539_v44  ;;  %v600_v59 = vpop.f32.mrb[3].mxu0 }
 0x1f4   : > { %v732_v60 = vpack.c.bf16 %v728_v53, %v725_v52  ;;  %v601_v61 = vadd.f32 %v1539_v44, %v600_v59 }
 0x1f5   : > { %v731_v62 = vpack.c.bf16 %v2697_v57, %v2693_v48  ;;  %v613_v63 = vpack.c.bf16 %v2699_v58, %v2695_v50 }
 0x1f6   : > { %v612_v0 = vpack.c.bf16 %v601_v61, %v598_v55  ;;  %1754 = vmatpush3.bf16.xpose.msra.mxu1 %v732_v60 }
 0x1f7   : > { %1759 = vmatprep.subr.bf16.mxu1 %v2274_v20 }
 0x1fd   : > { %1756 = vmatmul.mubr.bf16.vlgmr.msra.gmra.mrb[8].mxu1 %v612_v0 }
 0x1fe   : > { %1761 = vmatprep.mubr.msk.bf16.mxu1 %vm2275_vm0, %v2274_v20 }
 0x20f   : > { %v966_v12 = vpop.f32.mrb[4].mxu1 }
 0x210   : > { %v1711_v2 = vpop.f32.mrb[4].mxu0  ;;  %v1731_v13 = vpop.f32.mrb[5].mxu1 }
 0x211   : > { %v844_v3 = vadd.f32 %v1711_v2, %v1557_v1  ;;  %v835_v4 = vpop.f32.mrb[5].mxu0  ;;  %v969_v16 = vpop.f32.mrb[6].mxu1 }
 0x212   : > { %v836_v5 = vadd.f32 %v1557_v1, %v835_v4  ;;  %v1712_v6 = vpop.f32.mrb[6].mxu0  ;;  %v1732_v19 = vpop.f32.mrb[7].mxu1 }
 0x213   : > { %v847_v7 = vadd.f32 %v1712_v6, %v1557_v1  ;;  %v838_v8 = vpop.f32.mrb[7].mxu0 }
 0x214   : > { %v839_v9 = vadd.f32 %v1557_v1, %v838_v8 }
 0x215   : > { %v851_v10 = vpack.c.bf16 %v847_v7, %v844_v3 }
 0x216   : > { %v850_v11 = vpack.c.bf16 %v839_v9, %v836_v5 }
 0x218   : > { %1760 = vmatpush3.bf16.msra.mxu1 %v850_v11 }
 0x219   : > { %1765 = vmatprep.subr.bf16.mxu1 %v2274_v20 }
 0x230   : > { %v1055_v14 = vpop.f32.mrb[8].mxu0 }
 0x231   : > { %v1056_v15 = vadd.f32 %v1055_v14, %v966_v12  ;;  %v1751_v17 = vpop.f32.mrb[9].mxu0 }
 0x232   : > { %v1058_v21 = vpop.f32.mrb[10].mxu0 }
 0x233   : > { %v1059_v22 = vadd.f32 %v1058_v21, %v969_v16  ;;  %v1752_v23 = vpop.f32.mrb[11].mxu0  ;;  %v2729_v49 = vadd.f32 %v1582_v18, %v1056_v15 }
 0x235   : > { %v2715_v24 = vadd.f32 %v1582_v18, %v1059_v22  ;;  %v1068_v53 = vmax.f32 %v2729_v49, 0.0 }
 0x237   : > { %v1069_v16 = vmax.f32 %v2715_v24, 0.0 }
 0x2d0   : > { %v1108_v29 = vpop.f32.mrb[8].mxu1 }
 0x2d1   : > { %v1109_v30 = vadd.f32 %v1108_v29, %v1073_v28  ;;  %v1757_v31 = vpop.f32.mrb[9].mxu1 }
 0x2d2   : > { %v1111_v32 = vpop.f32.mrb[10].mxu1 }
 0x2d3   : > { %v1112_v33 = vadd.f32 %v1111_v32, %v1073_v28  ;;  %v1758_v34 = vpop.f32.mrb[11].mxu1  ;;  %v1116_v35 = vsel %vm1115_vm2, %v1109_v30, -inf }
 0x2d4   : > { %1117 = vmax.xlane.f32.xlu0 %v1116_v35 }
 0x2d5   : > { %v1119_v36 = vsel %vm1115_vm2, %v1112_v33, -inf }
 0x2d8   : > { %1120 = vmax.xlane.f32.xlu0 %v1119_v36 }
 0x361   : > { %v1118_v37 = vpop.xlane.xlu0 %1117 }
 0x362   : > { %v1122_v38 = vsub.f32 %v1109_v30, %v1118_v37 }
 0x364   : > { %v1124_v39 = vmul.f32 1.442695, %v1122_v38 }
 0x365   : > { %v1121_v40 = vpop.xlane.xlu0 %1120 }
 0x366   : > { %1933 = vpow2.f32 %v1124_v39  ;;  %v1123_v41 = vsub.f32 %v1112_v33, %v1121_v40 }
 0x368   : > { %v1126_v42 = vmul.f32 1.442695, %v1123_v41 }
 0x36a   : > { %1935 = vpow2.f32 %v1126_v42 }
 0x370   : > { %v1934_v43 = vpop.eup %1933 }
 0x371   : > { %v1128_v44 = vsel %vm1115_vm2, %v1934_v43, 0.0 }
 0x372   : > { %1129 = vadd.xlane.f32.xlu0 %v1128_v44 }
 0x374   : > { %v1936_v45 = vpop.eup %1935 }
 0x375   : > { %v1134_v46 = vpack.c.bf16 %v1936_v45, %v1934_v43  ;;  %v1131_v1 = vsel %vm1115_vm2, %v1936_v45, 0.0 }
 0x377   : > { %1762 = vmatmul.mubr.msk.bf16.vlgmr.msra.gmra.mrb[12].mxu1 %vm1115_vm2, %v1134_v46 }
 0x378   : > { %1766 = vmatpush3.bf16.xpose.msra.mxu1 %v731_v62  ;;  %1767 = vmatprep.mubr.msk.bf16.mxu1 %vm2275_vm0, %v2274_v20 }
 0x379   : > { %1771 = vmatprep.subr.bf16.mxu1 %v2274_v20 }
 0x37f   : > { %1768 = vmatmul.mubr.bf16.vlgmr.msra.gmra.mrb[16].mxu1 %v613_v63 }
 0x380   : > { %1772 = vmatpush3.bf16.msra.mxu1 %v851_v10  ;;  %1773 = vmatprep.mubr.msk.bf16.mxu1 %vm2275_vm0, %v2274_v20 }
 0x3ff   : > { %v1130_v47 = vpop.xlane.xlu0 %1129 }
 0x400   : > { %1937 = vrcp.f32 %v1130_v47 }
 0x40a   : > { %v1938_v48 = vpop.eup %1937 }
 0x40b   : > { %v1181_v51 = vmul.f32 0.17677669, %v1938_v48 }
 0x44a   : > { %v1172_v52 = vpop.f32.mrb[12].mxu1 }
 0x44b   : > { %v1183_v54 = vmul.f32 %v1181_v51, %v1172_v52  ;;  %v1763_v55 = vpop.f32.mrb[13].mxu1 }
 0x44c   : > { %v1175_v56 = vpop.f32.mrb[14].mxu1 }
 0x44d   : > { %v1185_v50 = vadd.f32 %v1183_v54, %v1068_v53  ;;  %v1764_v57 = vpop.f32.mrb[15].mxu1 }
 0x44f   : > { %1187 = vst [vmem:[%s2737_s29] sm:$0xff] %v1185_v50 }
 0x452   : > { %v1223_v20 = vpop.f32.mrb[16].mxu1 }
 0x453   : > { %v1224_v58 = vadd.f32 %v1223_v20, %v1073_v28  ;;  %v1769_v59 = vpop.f32.mrb[17].mxu1 }
 0x454   : > { %v1226_v60 = vpop.f32.mrb[18].mxu1 }
 0x455   : > { %v1227_v61 = vadd.f32 %v1226_v60, %v1073_v28  ;;  %v1770_v62 = vpop.f32.mrb[19].mxu1  ;;  %v1230_v63 = vsel %vm1115_vm2, %v1224_v58, -inf }
 0x456   : > { %1231 = vmax.xlane.f32.xlu1 %v1230_v63 }
 0x457   : > { %v1233_v0 = vsel %vm1115_vm2, %v1227_v61, -inf }
 0x45a   : > { %1234 = vmax.xlane.f32.xlu1 %v1233_v0 }
 0x45e   : > { %1132 = vadd.xlane.f32.xlu1 %v1131_v1 }
 0x4e3   : > { %v1232_v2 = vpop.xlane.xlu1 %1231 }
 0x4e4   : > { %v1236_v3 = vsub.f32 %v1224_v58, %v1232_v2 }
 0x4e6   : > { %v1238_v4 = vmul.f32 1.442695, %v1236_v3 }
 0x4e7   : > { %v1235_v5 = vpop.xlane.xlu1 %1234 }
 0x4e8   : > { %1939 = vpow2.f32 %v1238_v4  ;;  %v1237_v6 = vsub.f32 %v1227_v61, %v1235_v5 }
 0x4ea   : > { %v1240_v7 = vmul.f32 1.442695, %v1237_v6 }
 0x4eb   : > { %v1133_v8 = vpop.xlane.xlu1 %1132 }
 0x4ec   : > { %1941 = vpow2.f32 %v1240_v7 }
 0x4ed   : > { %1943 = vrcp.f32 %v1133_v8 }
 0x4f2   : > { %v1940_v9 = vpop.eup %1939 }
 0x4f3   : > { %v1242_v10 = vsel %vm1115_vm2, %v1940_v9, 0.0 }
 0x4f4   : > { %1243 = vadd.xlane.f32.xlu0 %v1242_v10 }
 0x4f6   : > { %v1942_v11 = vpop.eup %1941 }
 0x4f7   : > { %v1944_v12 = vpop.eup %1943  ;;  %v1245_v13 = vsel %vm1115_vm2, %v1942_v11, 0.0  ;;  %v1248_v14 = vpack.c.bf16 %v1942_v11, %v1940_v9 }
 0x4f8   : > { %v1182_v15 = vmul.f32 0.17677669, %v1944_v12  ;;  %1246 = vadd.xlane.f32.xlu1 %v1245_v13 }
 0x4f9   : > { %1774 = vmatmul.mubr.msk.bf16.vlgmr.msra.gmra.mrb[20].mxu1 %vm1115_vm2, %v1248_v14 }
 0x4fa   : > { %v1184_v17 = vmul.f32 %v1182_v15, %v1175_v56 }
 0x4fc   : > { %v1186_v18 = vadd.f32 %v1184_v17, %v1069_v16 }
 0x4fe   : > { %1188 = vst [vmem:[%s2737_s29 + $0x8] sm:$0xff] %v1186_v18 }
 0x4ff   : > { %2162 = shalt.err (!%p2159_p8)
}
 0x500   : > { %s2163_s4 = scalar_lea.hbm %s2757_s20, 256  ;;  %s2167_s21 = scalar_lea.hbm %s2852_s8, 512 }
 0x501   : > { %p2164_p11 = scmp.ne.s32.totalorder %s2757_s20, %s2163_s4  ;;  %p2168_p1 = scmp.lt.u32.totalorder %s2757_s20, %s2852_s8 }
 0x502   : > { %p2169_p13 = scmp.lt.u32.totalorder %s2167_s21, %s2163_s4  ;;  %p2171_p7 = scmp.lt.u32.totalorder %s2163_s4, %s2757_s20 }
 0x503   : > { %p2165_p3 = pnand %p2164_p11, %p2893_p2 }
 0x504   : > { %p2170_p0 = por %p2169_p13, %p2168_p1 }
 0x505   : > { %p2166_p12 = pneg %p2165_p3 }
 0x506   : > { %p2172_p6 = por %p2171_p7, %p2170_p0 }
 0x508   : > { %p2173_p10 = pnand %p2172_p6, %p2166_p12 }
 0x50a   : > { %2176 = shalt.err (!%p2173_p10)
}
 0x50b   : > { %s2278_s26 = smov 128   ;;  %s2279_s29 = smov 8  }
 0x50c   : > { %1801 = dma.vmem_to_hbm [thread:$0]  (%p2893_p2), %s2749_s23, 256, %s2757_s20, %s1304_s9, %s2278_s26, %s2278_s26, %s2279_s29  }
 0x50d   : > { %s473_s0 = scalar_lea.vmem [#allocation15], %s1535_s5  ;;  %s2894_s20 = sld [smem:[#allocation31_spill]] }
 0x50e   : > { %s1338_s14 = sshll.u32 %s473_s0, 4  ;;  %s1309_s2 = scalar_lea.sflag [#allocation16], %s2621_s22  ;;  %s2790_s14 = int_to_ptr.vmem [resolvable:$true] %s1338_s14 }
 0x50f   : > { %s2177_s16 = scalar_lea.vmem %s2790_s14, 256  ;;  %s2280_s18 = smov [#allocation15]  }
 0x510   : > { %p2178_p5 = scmp.ne.s32.totalorder %s2790_s14, %s2177_s16  ;;  %s2181_s24 = sshll.u32 %s2280_s18, 4  ;;  %s2182_s24 = int_to_ptr.vmem [resolvable:$false] %s2181_s24 }
 0x511   : > { %s2183_s4 = scalar_lea.vmem %s2182_s24, 512  ;;  %p2184_p8 = scmp.lt.s32.totalorder %s2790_s14, %s2182_s24 }
 0x512   : > { %p2179_p9 = pnand %p2178_p5, %p2893_p2  ;;  %p2185_p11 = scmp.lt.s32.totalorder %s2183_s4, %s2177_s16 }
 0x513   : > { %s2797_s9 = scalar_lea.hbm %s2894_s20, %s1595_s19 }
 0x514   : > { %p2180_p4 = pneg %p2179_p9  ;;  %p2186_p3 = por %p2185_p11, %p2184_p8 }
 0x516   : > { %p2187_p12 = pnand %p2186_p3, %p2180_p4 }
 0x581   : > { %v1244_v19 = vpop.xlane.xlu0 %1243 }
 0x582   : > { %1945 = vrcp.f32 %v1244_v19 }
 0x585   : > { %v1247_v21 = vpop.xlane.xlu1 %1246 }
 0x586   : > { %1947 = vrcp.f32 %v1247_v21 }
 0x58c   : > { %v1946_v22 = vpop.eup %1945 }
 0x58d   : > { %v1295_v24 = vmul.f32 0.17677669, %v1946_v22 }
 0x590   : > { %v1948_v23 = vpop.eup %1947 }
 0x591   : > { %v1296_v28 = vmul.f32 0.17677669, %v1948_v23 }
 0x5cc   : > { %v1286_v25 = vpop.f32.mrb[20].mxu1 }
 0x5cd   : > { %v1297_v26 = vmul.f32 %v1295_v24, %v1286_v25  ;;  %v1775_v27 = vpop.f32.mrb[21].mxu1 }
 0x5ce   : > { %v1289_v29 = vpop.f32.mrb[22].mxu1 }
 0x5cf   : > { %v1299_v30 = vadd.f32 %v1297_v26, %v1068_v53  ;;  %v1298_v31 = vmul.f32 %v1296_v28, %v1289_v29  ;;  %v1776_v32 = vpop.f32.mrb[23].mxu1 }
 0x5d1   : > { %1301 = vst [vmem:[%s473_s0] sm:$0xff] %v1299_v30  ;;  %v1300_v33 = vadd.f32 %v1298_v31, %v1069_v16 }
 0x5d3   : > { %1302 = vst [vmem:[%s473_s0 + $0x8] sm:$0xff] %v1300_v33 }
 0x5d4   : > { %2190 = shalt.err (!%p2187_p12)
}
 0x5d5   : > { %s2191_s15 = scalar_lea.hbm %s2797_s9, 256  ;;  %s2195_s13 = scalar_lea.hbm %s2894_s20, 512 }
 0x5d6   : > { %p2192_p1 = scmp.ne.s32.totalorder %s2797_s9, %s2191_s15  ;;  %p2196_p7 = scmp.lt.u32.totalorder %s2797_s9, %s2894_s20 }
 0x5d7   : > { %p2197_p6 = scmp.lt.u32.totalorder %s2195_s13, %s2191_s15  ;;  %p2199_p5 = scmp.lt.u32.totalorder %s2191_s15, %s2797_s9 }
 0x5d8   : > { %p2193_p13 = pnand %p2192_p1, %p2893_p2 }
 0x5d9   : > { %p2198_p10 = por %p2197_p6, %p2196_p7 }
 0x5da   : > { %p2194_p0 = pneg %p2193_p13 }
 0x5db   : > { %p2200_p9 = por %p2199_p5, %p2198_p10 }
 0x5dd   : > { %p2201_p4 = pnand %p2200_p9, %p2194_p0 }
 0x5df   : > { %2204 = shalt.err (!%p2201_p4)
}
 0x5e0   : > { %1802 = dma.vmem_to_hbm [thread:$0]  (%p2893_p2), %s2790_s14, 256, %s2797_s9, %s1309_s2, %s2278_s26, %s2278_s26, %s2279_s29  }
 0x5e1 PF: > { %s1353_s3 = sand.u32 1, %s2251_s30   ;;  %p2895_p8 = scmp.ne.s32.totalorder %s2881_s28, 0 }
 0x5e2   : > { %p2896_p11 = scmp.ge.s32.totalorder %s2263_s12, 2  ;;  %s1354_s0 = scalar_lea.sflag [#allocation4], %s1353_s3 }
 0x5e4   : > { %p1829_p3 = pnand %p2896_p11, %p2895_p8 }
 0x5e6   : > { %2242 = dma.done.wait (!%p1829_p3), %s1354_s0, 256  }
 0x5e7   : > { %2244 = vsyncadd (!%p1829_p3), %s1354_s0, 4294967040  ;;  %s1363_s25 = scalar_lea.sflag [#allocation16], %s1353_s3 }
 0x5e8   : > { %2246 = dma.done.wait (!%p1829_p3), %s1363_s25, 256  }
 0x5e9   : > { %2248 = vsyncadd (!%p1829_p3), %s1363_s25, 4294967040  ;;  %s2897_s22 = sld [smem:[#allocation24_spill]]  ;;  %p31_p2 = scmp.ge.s32.totalorder %s2504_s27, 4  }
 0x5ea   : > { %s2898_s30 = smov %s2255_s10  ;;  %s2899_s10 = smov %s2259_s11 }
 0x5eb   : > { %s2901_s12 = smov %s2504_s27  ;;  %33 = sbr.rel (!%p31_p2) target bundleno = 19 (0x13), region = 147 }
 0x5ef   : > { %s2900_s11 = smov %s2897_s22 }
 0x5f2   :  { %1368 = vsyncpa [#allocation3], 1 }
 0x5f3   :  { %1370 = vsyncpa [#allocation3 + $0x1], 1 }
 0x5f4   :  { %1371 = vsyncpa [#allocation6], 1 }
 0x5f5   :  { %1373 = vsyncpa [#allocation6 + $0x1], 1 }
 0x5f6   :  { %1374 = vsyncpa [#allocation9], 1 }
 0x5f7   :  { %1375 = vsyncpa [#allocation12], 1 }
 0x5f8   :  { %1376 = vsyncpa [#allocation4], 1 }
 0x5f9   :  { %1378 = vsyncpa [#allocation4 + $0x1], 1 }
 0x5fa   :  { %1379 = vsyncpa [#allocation16], 1 }
 0x5fb   :  { %1381 = vsyncpa [#allocation16 + $0x1], 1 }

</bundles_post_ra>
